<compile_context>
chip_gen: v7x
topology: tpu7x:2x2x1
jax: 0.10.0
libtpu: 0.0.40
codegen_flags: <defaults>
</compile_context>

<pallas_src>
import jax
import jax.numpy as jnp
import numpy as np
from jax import lax
from jax.experimental import pallas as pl
from jax.experimental.pallas import tpu as pltpu


def _lstm_kernel(x_ref, h0_ref, c0_ref, w_ref, b_ref, out_ref, h_scr, c_scr):
    """One grid step = one (batch_block, time_chunk) tile.

    x_ref  : (TC, Bb, E)   compute dtype (bf16 by default)
    h0_ref : (Bb, Nh)      f32
    c0_ref : (Bb, Nh)      f32
    w_ref  : (E+Nh, 4*Nh)  compute dtype, fused [W_x ; W_h] for gates [i|f|g|o]
    b_ref  : (1, 4*Nh)     f32, fused biases
    out_ref: (TC, Bb, Nh)  f32
    h_scr, c_scr : (Bb, Nh) f32 VMEM carries, persist across time-chunk steps.
    """
    ti = pl.program_id(1)  # time-chunk index (sequential / "arbitrary")

    @pl.when(ti == 0)
    def _():
        h_scr[...] = h0_ref[...].astype(jnp.float32)
        c_scr[...] = c0_ref[...].astype(jnp.float32)

    tc, bb, _ = x_ref.shape
    nh = h_scr.shape[-1]

    w = w_ref[...]                                      # fused weights (bf16), loaded once
    bias = jnp.broadcast_to(b_ref[...], (bb, 4 * nh))   # hoisted out of the time loop

    def step(t, carry):
        X = x_ref[t]                                    # (Bb, E), compute dtype
        H = h_scr[...]                                  # (Bb, Nh), f32
        C = c_scr[...]                                  # (Bb, Nh), f32
        # Single fused MXU push: [X | H] @ [W_x ; W_h] -> (Bb, 4*Nh), f32 accumulate.
        xh = jnp.concatenate([X, H.astype(w.dtype)], axis=-1)
        gates = jnp.dot(xh, w, preferred_element_type=jnp.float32) + bias
        I = jax.nn.sigmoid(gates[:, 0 * nh:1 * nh])
        F = jax.nn.sigmoid(gates[:, 1 * nh:2 * nh])
        G = jnp.tanh(gates[:, 2 * nh:3 * nh])
        O = jax.nn.sigmoid(gates[:, 3 * nh:4 * nh])
        C_new = F * C + I * G                           # elementwise stays f32 (v5e-safe)
        H_new = O * jnp.tanh(C_new)
        c_scr[...] = C_new
        h_scr[...] = H_new
        out_ref[t] = H_new
        return carry

    # In-kernel time loop: avoids per-timestep grid/pipeline overhead.
    lax.fori_loop(0, tc, step, None, unroll=(tc <= 32))


def cell_lstm_forward(inputs, h0, c0, params, *, time_chunk=32, batch_block=None,
                      compute_dtype=jnp.bfloat16):
    """inputs: (T, B, E) f32; h0, c0: (B, Nh) f32; params: dict of per-gate weights."""
    T, B, E = inputs.shape
    Nh = h0.shape[1]
    G4 = 4 * Nh

    # Fuse the 8 weight matrices into one (E+Nh, 4*Nh) operand, gate order [i|f|g|o].
    w_x = jnp.concatenate(
        [params["W_xi"], params["W_xf"], params["W_ig"], params["W_xo"]], axis=1)
    w_h = jnp.concatenate(
        [params["W_hi"], params["W_hf"], params["W_hg"], params["W_ho"]], axis=1)
    w = jnp.concatenate([w_x, w_h], axis=0).astype(compute_dtype)        # (E+Nh, 4Nh)
    b = jnp.concatenate(
        [params["b_i"], params["b_f"], params["b_g"], params["b_o"]],
        axis=1).astype(jnp.float32)                                      # (1, 4Nh)

    x = inputs.astype(compute_dtype)

    if batch_block is None:
        batch_block = B                     # single batch block at toy sizes
    assert B % batch_block == 0
    n_bblk = B // batch_block

    tc = min(time_chunk, T)
    n_tc = pl.cdiv(T, tc)
    T_pad = n_tc * tc
    if T_pad != T:
        # Zero-pad time; padded steps run after all real steps and are sliced off.
        x = jnp.pad(x, ((0, T_pad - T), (0, 0), (0, 0)))

    grid_spec = pltpu.PrefetchScalarGridSpec(
        num_scalar_prefetch=0,
        grid=(n_bblk, n_tc),                # (parallel batch blocks, sequential time chunks)
        in_specs=[
            pl.BlockSpec((tc, batch_block, E), lambda bi, ti: (ti, bi, 0)),   # x
            pl.BlockSpec((batch_block, Nh), lambda bi, ti: (bi, 0)),          # h0
            pl.BlockSpec((batch_block, Nh), lambda bi, ti: (bi, 0)),          # c0
            pl.BlockSpec((E + Nh, G4), lambda bi, ti: (0, 0)),                # fused W
            pl.BlockSpec((1, G4), lambda bi, ti: (0, 0)),                     # fused b
        ],
        out_specs=pl.BlockSpec((tc, batch_block, Nh), lambda bi, ti: (ti, bi, 0)),
        scratch_shapes=[
            pltpu.VMEM((batch_block, Nh), jnp.float32),   # H carry
            pltpu.VMEM((batch_block, Nh), jnp.float32),   # C carry
        ],
    )

    out = pl.pallas_call(
        _lstm_kernel,
        out_shape=jax.ShapeDtypeStruct((T_pad, B, Nh), jnp.float32),
        grid_spec=grid_spec,
        compiler_params=pltpu.CompilerParams(
            dimension_semantics=("parallel", "arbitrary")),
    )(x, h0.astype(jnp.float32), c0.astype(jnp.float32), w, b)

    return out[:T] if T_pad != T else out


def reference_forward(inputs, h0, c0, p, compute_dtype=jnp.float32):
    """Pure-JAX reference mirroring the PyTorch loop; matmul operands cast to
    `compute_dtype` with f32 accumulation (same numerics policy as the kernel)."""
    cd = compute_dtype

    def mm(a, w):
        return jnp.dot(a.astype(cd), w.astype(cd), preferred_element_type=jnp.float32)

    def step(carry, X):
        H, C = carry
        I = jax.nn.sigmoid(mm(X, p["W_xi"]) + mm(H, p["W_hi"]) + p["b_i"])
        F = jax.nn.sigmoid(mm(X, p["W_xf"]) + mm(H, p["W_hf"]) + p["b_f"])
        G = jnp.tanh(mm(X, p["W_ig"]) + mm(H, p["W_hg"]) + p["b_g"])
        O = jax.nn.sigmoid(mm(X, p["W_xo"]) + mm(H, p["W_ho"]) + p["b_o"])
        C = F * C + I * G
        H = O * jnp.tanh(C)
        return (H, C), H

    _, outs = jax.lax.scan(step, (h0, c0), inputs)
    return outs


if __name__ == "__main__":
    # Small shapes consistent with the module's forward.
    seq_len, batch, emb_size, n_hidden = 8, 8, 16, 32

    key = jax.random.PRNGKey(0)
    keys = jax.random.split(key, 16)

    params = {
        "W_xi": jax.random.normal(keys[0], (emb_size, n_hidden), jnp.float32),
        "W_xf": jax.random.normal(keys[1], (emb_size, n_hidden), jnp.float32),
        "W_ig": jax.random.normal(keys[2], (emb_size, n_hidden), jnp.float32),
        "W_xo": jax.random.normal(keys[3], (emb_size, n_hidden), jnp.float32),
        "W_hi": jax.random.normal(keys[4], (n_hidden, n_hidden), jnp.float32),
        "W_hf": jax.random.normal(keys[5], (n_hidden, n_hidden), jnp.float32),
        "W_hg": jax.random.normal(keys[6], (n_hidden, n_hidden), jnp.float32),
        "W_ho": jax.random.normal(keys[7], (n_hidden, n_hidden), jnp.float32),
        "b_i": jax.random.normal(keys[8], (1, n_hidden), jnp.float32),
        "b_f": jax.random.normal(keys[9], (1, n_hidden), jnp.float32),
        "b_g": jax.random.normal(keys[10], (1, n_hidden), jnp.float32),
        "b_o": jax.random.normal(keys[11], (1, n_hidden), jnp.float32),
    }

    inputs = jax.random.normal(keys[12], (seq_len, batch, emb_size), jnp.float32)
    h0 = jax.random.normal(keys[13], (batch, n_hidden), jnp.float32)
    c0 = jax.random.normal(keys[14], (batch, n_hidden), jnp.float32)

    out = cell_lstm_forward(inputs, h0, c0, params)          # bf16 matmuls, f32 elsewhere
    out = jax.block_until_ready(out)

    # Compare against a reference with the SAME numerics policy (bf16 matmul
    # operands, f32 accumulation/carries).  Tolerance is generous only to absorb
    # rare bf16 re-quantization of the recurrent carry; implementation bugs
    # (wrong gate order / slices) would produce O(1) errors.
    ref = jax.block_until_ready(
        reference_forward(inputs, h0, c0, params, compute_dtype=jnp.bfloat16))
    np.testing.assert_allclose(np.asarray(out), np.asarray(ref), rtol=5e-2, atol=5e-2)

    print("KERNEL_OK")
</pallas_src>

<mosaic_0001>
module attributes {stable_mosaic.version = 11 : i64} {
  func.func @_lstm_kernel(%arg0: i32, %arg1: i32, %arg2: memref<8x8x16xbf16, #tpu.memory_space<vmem>>, %arg3: memref<8x32xf32, #tpu.memory_space<vmem>>, %arg4: memref<8x32xf32, #tpu.memory_space<vmem>>, %arg5: memref<48x128xbf16, #tpu.memory_space<vmem>>, %arg6: memref<1x128xf32, #tpu.memory_space<vmem>>, %arg7: memref<8x8x32xf32, #tpu.memory_space<vmem>>, %arg8: memref<8x32xf32, #tpu.memory_space<vmem>>, %arg9: memref<8x32xf32, #tpu.memory_space<vmem>>) attributes {dimension_semantics = [#tpu.dimension_semantics<parallel>, #tpu.dimension_semantics<arbitrary>], iteration_bounds = array<i64: 1, 1>, scalar_prefetch = 0 : i64, scratch_operands = 2 : i64, tpu.core_type = #tpu.core_type<tc>, window_params = [{transform_indices = @transform_0, window_bounds = array<i64: 8, 8, 16>}, {transform_indices = @transform_1, window_bounds = array<i64: 8, 32>}, {transform_indices = @transform_2, window_bounds = array<i64: 8, 32>}, {pipeline_mode = #tpu.pipeline_mode<synchronous>, transform_indices = @transform_3, window_bounds = array<i64: 48, 128>}, {pipeline_mode = #tpu.pipeline_mode<synchronous>, transform_indices = @transform_4, window_bounds = array<i64: 1, 128>}, {transform_indices = @transform_5, window_bounds = array<i64: 8, 8, 32>}]} {
    %c0_i32 = arith.constant 0 : i32
    %0 = arith.cmpi eq, %arg1, %c0_i32 : i32
    %1 = arith.extui %0 : i1 to i32
    %c0_i32_0 = arith.constant 0 : i32
    %2 = arith.cmpi ne, %1, %c0_i32_0 : i32
    scf.if %2 {
      %c0_132 = arith.constant 0 : index
      %c0_133 = arith.constant 0 : index
      %327 = vector.load %arg3[%c0_132, %c0_133] : memref<8x32xf32, #tpu.memory_space<vmem>>, vector<8x32xf32>
      %c0_134 = arith.constant 0 : index
      %c0_135 = arith.constant 0 : index
      %328 = vector.load %arg8[%c0_134, %c0_135] : memref<8x32xf32, #tpu.memory_space<vmem>>, vector<8x32xf32>
      tpu.vector_store %arg8[%c0_134, %c0_135], %327 {strides = array<i32>} : memref<8x32xf32, #tpu.memory_space<vmem>>, vector<8x32xf32>,
      %c0_136 = arith.constant 0 : index
      %c0_137 = arith.constant 0 : index
      %329 = vector.load %arg4[%c0_136, %c0_137] : memref<8x32xf32, #tpu.memory_space<vmem>>, vector<8x32xf32>
      %c0_138 = arith.constant 0 : index
      %c0_139 = arith.constant 0 : index
      %330 = vector.load %arg9[%c0_138, %c0_139] : memref<8x32xf32, #tpu.memory_space<vmem>>, vector<8x32xf32>
      tpu.vector_store %arg9[%c0_138, %c0_139], %329 {strides = array<i32>} : memref<8x32xf32, #tpu.memory_space<vmem>>, vector<8x32xf32>,
    } else {
    }
    %c0 = arith.constant 0 : index
    %c0_1 = arith.constant 0 : index
    %3 = vector.load %arg5[%c0, %c0_1] : memref<48x128xbf16, #tpu.memory_space<vmem>>, vector<48x128xbf16>
    %c0_2 = arith.constant 0 : index
    %c0_3 = arith.constant 0 : index
    %4 = vector.load %arg6[%c0_2, %c0_3] : memref<1x128xf32, #tpu.memory_space<vmem>>, vector<1x128xf32>
    %5 = vector.shape_cast %4 : vector<1x128xf32> to vector<1x128xf32>
    %6 = vector.broadcast %5 : vector<1x128xf32> to vector<8x128xf32>
    %c0_i32_4 = arith.constant 0 : i32
    %7 = arith.index_cast %c0_i32_4 : i32 to index
    %c0_5 = arith.constant 0 : index
    %c0_6 = arith.constant 0 : index
    %8 = vector.load %arg2[%7, %c0_5, %c0_6] : memref<8x8x16xbf16, #tpu.memory_space<vmem>>, vector<1x8x16xbf16>
    %9 = vector.shape_cast %8 : vector<1x8x16xbf16> to vector<8x16xbf16>
    %c0_7 = arith.constant 0 : index
    %c0_8 = arith.constant 0 : index
    %10 = vector.load %arg8[%c0_7, %c0_8] : memref<8x32xf32, #tpu.memory_space<vmem>>, vector<8x32xf32>
    %c0_9 = arith.constant 0 : index
    %c0_10 = arith.constant 0 : index
    %11 = vector.load %arg9[%c0_9, %c0_10] : memref<8x32xf32, #tpu.memory_space<vmem>>, vector<8x32xf32>
    %12 = arith.truncf %10 : vector<8x32xf32> to vector<8x32xbf16>
    %13 = tpu.concatenate %9, %12 in 1 : vector<8x16xbf16>, vector<8x32xbf16> -> vector<8x48xbf16>
    %cst = arith.constant dense<0.000000e+00> : vector<8x128xf32>
    %14 = tpu.matmul %13, %3, %cst {dimension_numbers = #tpu.dot_dimension_numbers<[1], [0], [0], [1], [0, 0, 1, 1], [], []>} : vector<8x48xbf16>, vector<48x128xbf16>, vector<8x128xf32> -> vector<8x128xf32>
    %15 = arith.addf %14, %6 : vector<8x128xf32>
    %16 = vector.extract_strided_slice %15 {offsets = [0, 0], sizes = [8, 32], strides = [1, 1]} : vector<8x128xf32> to vector<8x32xf32>
    %17 = arith.negf %16 : vector<8x32xf32>
    %18 = math.exp %17 : vector<8x32xf32>
    %cst_11 = arith.constant 1.000000e+00 : f32
    %19 = vector.broadcast %cst_11 : f32 to vector<8x32xf32>
    %20 = arith.addf %19, %18 : vector<8x32xf32>
    %21 = arith.divf %19, %20 : vector<8x32xf32>
    %22 = vector.extract_strided_slice %15 {offsets = [0, 32], sizes = [8, 32], strides = [1, 1]} : vector<8x128xf32> to vector<8x32xf32>
    %23 = arith.negf %22 : vector<8x32xf32>
    %24 = math.exp %23 : vector<8x32xf32>
    %cst_12 = arith.constant 1.000000e+00 : f32
    %25 = vector.broadcast %cst_12 : f32 to vector<8x32xf32>
    %26 = arith.addf %25, %24 : vector<8x32xf32>
    %27 = arith.divf %25, %26 : vector<8x32xf32>
    %28 = vector.extract_strided_slice %15 {offsets = [0, 64], sizes = [8, 32], strides = [1, 1]} : vector<8x128xf32> to vector<8x32xf32>
    %29 = math.tanh %28 : vector<8x32xf32>
    %30 = vector.extract_strided_slice %15 {offsets = [0, 96], sizes = [8, 32], strides = [1, 1]} : vector<8x128xf32> to vector<8x32xf32>
    %31 = arith.negf %30 : vector<8x32xf32>
    %32 = math.exp %31 : vector<8x32xf32>
    %cst_13 = arith.constant 1.000000e+00 : f32
    %33 = vector.broadcast %cst_13 : f32 to vector<8x32xf32>
    %34 = arith.addf %33, %32 : vector<8x32xf32>
    %35 = arith.divf %33, %34 : vector<8x32xf32>
    %36 = arith.mulf %27, %11 : vector<8x32xf32>
    %37 = arith.mulf %21, %29 : vector<8x32xf32>
    %38 = arith.addf %36, %37 : vector<8x32xf32>
    %39 = math.tanh %38 : vector<8x32xf32>
    %40 = arith.mulf %35, %39 : vector<8x32xf32>
    %c0_14 = arith.constant 0 : index
    %c0_15 = arith.constant 0 : index
    %41 = vector.load %arg9[%c0_14, %c0_15] : memref<8x32xf32, #tpu.memory_space<vmem>>, vector<8x32xf32>
    tpu.vector_store %arg9[%c0_14, %c0_15], %38 {strides = array<i32>} : memref<8x32xf32, #tpu.memory_space<vmem>>, vector<8x32xf32>,
    %c0_16 = arith.constant 0 : index
    %c0_17 = arith.constant 0 : index
    %42 = vector.load %arg8[%c0_16, %c0_17] : memref<8x32xf32, #tpu.memory_space<vmem>>, vector<8x32xf32>
    tpu.vector_store %arg8[%c0_16, %c0_17], %40 {strides = array<i32>} : memref<8x32xf32, #tpu.memory_space<vmem>>, vector<8x32xf32>,
    %43 = arith.index_cast %c0_i32_4 : i32 to index
    %c0_18 = arith.constant 0 : index
    %c0_19 = arith.constant 0 : index
    %44 = vector.load %arg7[%43, %c0_18, %c0_19] : memref<8x8x32xf32, #tpu.memory_space<vmem>>, vector<1x8x32xf32>
    %45 = vector.shape_cast %44 : vector<1x8x32xf32> to vector<8x32xf32>
    %46 = vector.shape_cast %40 : vector<8x32xf32> to vector<1x8x32xf32>
    tpu.vector_store %arg7[%43, %c0_18, %c0_19], %46 {strides = array<i32>} : memref<8x8x32xf32, #tpu.memory_space<vmem>>, vector<1x8x32xf32>,
    %c1_i32 = arith.constant 1 : i32
    %47 = arith.index_cast %c1_i32 : i32 to index
    %c0_20 = arith.constant 0 : index
    %c0_21 = arith.constant 0 : index
    %48 = vector.load %arg2[%47, %c0_20, %c0_21] : memref<8x8x16xbf16, #tpu.memory_space<vmem>>, vector<1x8x16xbf16>
    %49 = vector.shape_cast %48 : vector<1x8x16xbf16> to vector<8x16xbf16>
    %c0_22 = arith.constant 0 : index
    %c0_23 = arith.constant 0 : index
    %50 = vector.load %arg8[%c0_22, %c0_23] : memref<8x32xf32, #tpu.memory_space<vmem>>, vector<8x32xf32>
    %c0_24 = arith.constant 0 : index
    %c0_25 = arith.constant 0 : index
    %51 = vector.load %arg9[%c0_24, %c0_25] : memref<8x32xf32, #tpu.memory_space<vmem>>, vector<8x32xf32>
    %52 = arith.truncf %50 : vector<8x32xf32> to vector<8x32xbf16>
    %53 = tpu.concatenate %49, %52 in 1 : vector<8x16xbf16>, vector<8x32xbf16> -> vector<8x48xbf16>
    %cst_26 = arith.constant dense<0.000000e+00> : vector<8x128xf32>
    %54 = tpu.matmul %53, %3, %cst_26 {dimension_numbers = #tpu.dot_dimension_numbers<[1], [0], [0], [1], [0, 0, 1, 1], [], []>} : vector<8x48xbf16>, vector<48x128xbf16>, vector<8x128xf32> -> vector<8x128xf32>
    %55 = arith.addf %54, %6 : vector<8x128xf32>
    %56 = vector.extract_strided_slice %55 {offsets = [0, 0], sizes = [8, 32], strides = [1, 1]} : vector<8x128xf32> to vector<8x32xf32>
    %57 = arith.negf %56 : vector<8x32xf32>
    %58 = math.exp %57 : vector<8x32xf32>
    %cst_27 = arith.constant 1.000000e+00 : f32
    %59 = vector.broadcast %cst_27 : f32 to vector<8x32xf32>
    %60 = arith.addf %59, %58 : vector<8x32xf32>
    %61 = arith.divf %59, %60 : vector<8x32xf32>
    %62 = vector.extract_strided_slice %55 {offsets = [0, 32], sizes = [8, 32], strides = [1, 1]} : vector<8x128xf32> to vector<8x32xf32>
    %63 = arith.negf %62 : vector<8x32xf32>
    %64 = math.exp %63 : vector<8x32xf32>
    %cst_28 = arith.constant 1.000000e+00 : f32
    %65 = vector.broadcast %cst_28 : f32 to vector<8x32xf32>
    %66 = arith.addf %65, %64 : vector<8x32xf32>
    %67 = arith.divf %65, %66 : vector<8x32xf32>
    %68 = vector.extract_strided_slice %55 {offsets = [0, 64], sizes = [8, 32], strides = [1, 1]} : vector<8x128xf32> to vector<8x32xf32>
    %69 = math.tanh %68 : vector<8x32xf32>
    %70 = vector.extract_strided_slice %55 {offsets = [0, 96], sizes = [8, 32], strides = [1, 1]} : vector<8x128xf32> to vector<8x32xf32>
    %71 = arith.negf %70 : vector<8x32xf32>
    %72 = math.exp %71 : vector<8x32xf32>
    %cst_29 = arith.constant 1.000000e+00 : f32
    %73 = vector.broadcast %cst_29 : f32 to vector<8x32xf32>
    %74 = arith.addf %73, %72 : vector<8x32xf32>
    %75 = arith.divf %73, %74 : vector<8x32xf32>
    %76 = arith.mulf %67, %51 : vector<8x32xf32>
    %77 = arith.mulf %61, %69 : vector<8x32xf32>
    %78 = arith.addf %76, %77 : vector<8x32xf32>
    %79 = math.tanh %78 : vector<8x32xf32>
    %80 = arith.mulf %75, %79 : vector<8x32xf32>
    %c0_30 = arith.constant 0 : index
    %c0_31 = arith.constant 0 : index
    %81 = vector.load %arg9[%c0_30, %c0_31] : memref<8x32xf32, #tpu.memory_space<vmem>>, vector<8x32xf32>
    tpu.vector_store %arg9[%c0_30, %c0_31], %78 {strides = array<i32>} : memref<8x32xf32, #tpu.memory_space<vmem>>, vector<8x32xf32>,
    %c0_32 = arith.constant 0 : index
    %c0_33 = arith.constant 0 : index
    %82 = vector.load %arg8[%c0_32, %c0_33] : memref<8x32xf32, #tpu.memory_space<vmem>>, vector<8x32xf32>
    tpu.vector_store %arg8[%c0_32, %c0_33], %80 {strides = array<i32>} : memref<8x32xf32, #tpu.memory_space<vmem>>, vector<8x32xf32>,
    %83 = arith.index_cast %c1_i32 : i32 to index
    %c0_34 = arith.constant 0 : index
    %c0_35 = arith.constant 0 : index
    %84 = vector.load %arg7[%83, %c0_34, %c0_35] : memref<8x8x32xf32, #tpu.memory_space<vmem>>, vector<1x8x32xf32>
    %85 = vector.shape_cast %84 : vector<1x8x32xf32> to vector<8x32xf32>
    %86 = vector.shape_cast %80 : vector<8x32xf32> to vector<1x8x32xf32>
    tpu.vector_store %arg7[%83, %c0_34, %c0_35], %86 {strides = array<i32>} : memref<8x8x32xf32, #tpu.memory_space<vmem>>, vector<1x8x32xf32>,
    %c2_i32 = arith.constant 2 : i32
    %87 = arith.index_cast %c2_i32 : i32 to index
    %c0_36 = arith.constant 0 : index
    %c0_37 = arith.constant 0 : index
    %88 = vector.load %arg2[%87, %c0_36, %c0_37] : memref<8x8x16xbf16, #tpu.memory_space<vmem>>, vector<1x8x16xbf16>
    %89 = vector.shape_cast %88 : vector<1x8x16xbf16> to vector<8x16xbf16>
    %c0_38 = arith.constant 0 : index
    %c0_39 = arith.constant 0 : index
    %90 = vector.load %arg8[%c0_38, %c0_39] : memref<8x32xf32, #tpu.memory_space<vmem>>, vector<8x32xf32>
    %c0_40 = arith.constant 0 : index
    %c0_41 = arith.constant 0 : index
    %91 = vector.load %arg9[%c0_40, %c0_41] : memref<8x32xf32, #tpu.memory_space<vmem>>, vector<8x32xf32>
    %92 = arith.truncf %90 : vector<8x32xf32> to vector<8x32xbf16>
    %93 = tpu.concatenate %89, %92 in 1 : vector<8x16xbf16>, vector<8x32xbf16> -> vector<8x48xbf16>
    %cst_42 = arith.constant dense<0.000000e+00> : vector<8x128xf32>
    %94 = tpu.matmul %93, %3, %cst_42 {dimension_numbers = #tpu.dot_dimension_numbers<[1], [0], [0], [1], [0, 0, 1, 1], [], []>} : vector<8x48xbf16>, vector<48x128xbf16>, vector<8x128xf32> -> vector<8x128xf32>
    %95 = arith.addf %94, %6 : vector<8x128xf32>
    %96 = vector.extract_strided_slice %95 {offsets = [0, 0], sizes = [8, 32], strides = [1, 1]} : vector<8x128xf32> to vector<8x32xf32>
    %97 = arith.negf %96 : vector<8x32xf32>
    %98 = math.exp %97 : vector<8x32xf32>
    %cst_43 = arith.constant 1.000000e+00 : f32
    %99 = vector.broadcast %cst_43 : f32 to vector<8x32xf32>
    %100 = arith.addf %99, %98 : vector<8x32xf32>
    %101 = arith.divf %99, %100 : vector<8x32xf32>
    %102 = vector.extract_strided_slice %95 {offsets = [0, 32], sizes = [8, 32], strides = [1, 1]} : vector<8x128xf32> to vector<8x32xf32>
    %103 = arith.negf %102 : vector<8x32xf32>
    %104 = math.exp %103 : vector<8x32xf32>
    %cst_44 = arith.constant 1.000000e+00 : f32
    %105 = vector.broadcast %cst_44 : f32 to vector<8x32xf32>
    %106 = arith.addf %105, %104 : vector<8x32xf32>
    %107 = arith.divf %105, %106 : vector<8x32xf32>
    %108 = vector.extract_strided_slice %95 {offsets = [0, 64], sizes = [8, 32], strides = [1, 1]} : vector<8x128xf32> to vector<8x32xf32>
    %109 = math.tanh %108 : vector<8x32xf32>
    %110 = vector.extract_strided_slice %95 {offsets = [0, 96], sizes = [8, 32], strides = [1, 1]} : vector<8x128xf32> to vector<8x32xf32>
    %111 = arith.negf %110 : vector<8x32xf32>
    %112 = math.exp %111 : vector<8x32xf32>
    %cst_45 = arith.constant 1.000000e+00 : f32
    %113 = vector.broadcast %cst_45 : f32 to vector<8x32xf32>
    %114 = arith.addf %113, %112 : vector<8x32xf32>
    %115 = arith.divf %113, %114 : vector<8x32xf32>
    %116 = arith.mulf %107, %91 : vector<8x32xf32>
    %117 = arith.mulf %101, %109 : vector<8x32xf32>
    %118 = arith.addf %116, %117 : vector<8x32xf32>
    %119 = math.tanh %118 : vector<8x32xf32>
    %120 = arith.mulf %115, %119 : vector<8x32xf32>
    %c0_46 = arith.constant 0 : index
    %c0_47 = arith.constant 0 : index
    %121 = vector.load %arg9[%c0_46, %c0_47] : memref<8x32xf32, #tpu.memory_space<vmem>>, vector<8x32xf32>
    tpu.vector_store %arg9[%c0_46, %c0_47], %118 {strides = array<i32>} : memref<8x32xf32, #tpu.memory_space<vmem>>, vector<8x32xf32>,
    %c0_48 = arith.constant 0 : index
    %c0_49 = arith.constant 0 : index
    %122 = vector.load %arg8[%c0_48, %c0_49] : memref<8x32xf32, #tpu.memory_space<vmem>>, vector<8x32xf32>
    tpu.vector_store %arg8[%c0_48, %c0_49], %120 {strides = array<i32>} : memref<8x32xf32, #tpu.memory_space<vmem>>, vector<8x32xf32>,
    %123 = arith.index_cast %c2_i32 : i32 to index
    %c0_50 = arith.constant 0 : index
    %c0_51 = arith.constant 0 : index
    %124 = vector.load %arg7[%123, %c0_50, %c0_51] : memref<8x8x32xf32, #tpu.memory_space<vmem>>, vector<1x8x32xf32>
    %125 = vector.shape_cast %124 : vector<1x8x32xf32> to vector<8x32xf32>
    %126 = vector.shape_cast %120 : vector<8x32xf32> to vector<1x8x32xf32>
    tpu.vector_store %arg7[%123, %c0_50, %c0_51], %126 {strides = array<i32>} : memref<8x8x32xf32, #tpu.memory_space<vmem>>, vector<1x8x32xf32>,
    %c3_i32 = arith.constant 3 : i32
    %127 = arith.index_cast %c3_i32 : i32 to index
    %c0_52 = arith.constant 0 : index
    %c0_53 = arith.constant 0 : index
    %128 = vector.load %arg2[%127, %c0_52, %c0_53] : memref<8x8x16xbf16, #tpu.memory_space<vmem>>, vector<1x8x16xbf16>
    %129 = vector.shape_cast %128 : vector<1x8x16xbf16> to vector<8x16xbf16>
    %c0_54 = arith.constant 0 : index
    %c0_55 = arith.constant 0 : index
    %130 = vector.load %arg8[%c0_54, %c0_55] : memref<8x32xf32, #tpu.memory_space<vmem>>, vector<8x32xf32>
    %c0_56 = arith.constant 0 : index
    %c0_57 = arith.constant 0 : index
    %131 = vector.load %arg9[%c0_56, %c0_57] : memref<8x32xf32, #tpu.memory_space<vmem>>, vector<8x32xf32>
    %132 = arith.truncf %130 : vector<8x32xf32> to vector<8x32xbf16>
    %133 = tpu.concatenate %129, %132 in 1 : vector<8x16xbf16>, vector<8x32xbf16> -> vector<8x48xbf16>
    %cst_58 = arith.constant dense<0.000000e+00> : vector<8x128xf32>
    %134 = tpu.matmul %133, %3, %cst_58 {dimension_numbers = #tpu.dot_dimension_numbers<[1], [0], [0], [1], [0, 0, 1, 1], [], []>} : vector<8x48xbf16>, vector<48x128xbf16>, vector<8x128xf32> -> vector<8x128xf32>
    %135 = arith.addf %134, %6 : vector<8x128xf32>
    %136 = vector.extract_strided_slice %135 {offsets = [0, 0], sizes = [8, 32], strides = [1, 1]} : vector<8x128xf32> to vector<8x32xf32>
    %137 = arith.negf %136 : vector<8x32xf32>
    %138 = math.exp %137 : vector<8x32xf32>
    %cst_59 = arith.constant 1.000000e+00 : f32
    %139 = vector.broadcast %cst_59 : f32 to vector<8x32xf32>
    %140 = arith.addf %139, %138 : vector<8x32xf32>
    %141 = arith.divf %139, %140 : vector<8x32xf32>
    %142 = vector.extract_strided_slice %135 {offsets = [0, 32], sizes = [8, 32], strides = [1, 1]} : vector<8x128xf32> to vector<8x32xf32>
    %143 = arith.negf %142 : vector<8x32xf32>
    %144 = math.exp %143 : vector<8x32xf32>
    %cst_60 = arith.constant 1.000000e+00 : f32
    %145 = vector.broadcast %cst_60 : f32 to vector<8x32xf32>
    %146 = arith.addf %145, %144 : vector<8x32xf32>
    %147 = arith.divf %145, %146 : vector<8x32xf32>
    %148 = vector.extract_strided_slice %135 {offsets = [0, 64], sizes = [8, 32], strides = [1, 1]} : vector<8x128xf32> to vector<8x32xf32>
    %149 = math.tanh %148 : vector<8x32xf32>
    %150 = vector.extract_strided_slice %135 {offsets = [0, 96], sizes = [8, 32], strides = [1, 1]} : vector<8x128xf32> to vector<8x32xf32>
    %151 = arith.negf %150 : vector<8x32xf32>
    %152 = math.exp %151 : vector<8x32xf32>
    %cst_61 = arith.constant 1.000000e+00 : f32
    %153 = vector.broadcast %cst_61 : f32 to vector<8x32xf32>
    %154 = arith.addf %153, %152 : vector<8x32xf32>
    %155 = arith.divf %153, %154 : vector<8x32xf32>
    %156 = arith.mulf %147, %131 : vector<8x32xf32>
    %157 = arith.mulf %141, %149 : vector<8x32xf32>
    %158 = arith.addf %156, %157 : vector<8x32xf32>
    %159 = math.tanh %158 : vector<8x32xf32>
    %160 = arith.mulf %155, %159 : vector<8x32xf32>
    %c0_62 = arith.constant 0 : index
    %c0_63 = arith.constant 0 : index
    %161 = vector.load %arg9[%c0_62, %c0_63] : memref<8x32xf32, #tpu.memory_space<vmem>>, vector<8x32xf32>
    tpu.vector_store %arg9[%c0_62, %c0_63], %158 {strides = array<i32>} : memref<8x32xf32, #tpu.memory_space<vmem>>, vector<8x32xf32>,
    %c0_64 = arith.constant 0 : index
    %c0_65 = arith.constant 0 : index
    %162 = vector.load %arg8[%c0_64, %c0_65] : memref<8x32xf32, #tpu.memory_space<vmem>>, vector<8x32xf32>
    tpu.vector_store %arg8[%c0_64, %c0_65], %160 {strides = array<i32>} : memref<8x32xf32, #tpu.memory_space<vmem>>, vector<8x32xf32>,
    %163 = arith.index_cast %c3_i32 : i32 to index
    %c0_66 = arith.constant 0 : index
    %c0_67 = arith.constant 0 : index
    %164 = vector.load %arg7[%163, %c0_66, %c0_67] : memref<8x8x32xf32, #tpu.memory_space<vmem>>, vector<1x8x32xf32>
    %165 = vector.shape_cast %164 : vector<1x8x32xf32> to vector<8x32xf32>
    %166 = vector.shape_cast %160 : vector<8x32xf32> to vector<1x8x32xf32>
    tpu.vector_store %arg7[%163, %c0_66, %c0_67], %166 {strides = array<i32>} : memref<8x8x32xf32, #tpu.memory_space<vmem>>, vector<1x8x32xf32>,
    %c4_i32 = arith.constant 4 : i32
    %167 = arith.index_cast %c4_i32 : i32 to index
    %c0_68 = arith.constant 0 : index
    %c0_69 = arith.constant 0 : index
    %168 = vector.load %arg2[%167, %c0_68, %c0_69] : memref<8x8x16xbf16, #tpu.memory_space<vmem>>, vector<1x8x16xbf16>
    %169 = vector.shape_cast %168 : vector<1x8x16xbf16> to vector<8x16xbf16>
    %c0_70 = arith.constant 0 : index
    %c0_71 = arith.constant 0 : index
    %170 = vector.load %arg8[%c0_70, %c0_71] : memref<8x32xf32, #tpu.memory_space<vmem>>, vector<8x32xf32>
    %c0_72 = arith.constant 0 : index
    %c0_73 = arith.constant 0 : index
    %171 = vector.load %arg9[%c0_72, %c0_73] : memref<8x32xf32, #tpu.memory_space<vmem>>, vector<8x32xf32>
    %172 = arith.truncf %170 : vector<8x32xf32> to vector<8x32xbf16>
    %173 = tpu.concatenate %169, %172 in 1 : vector<8x16xbf16>, vector<8x32xbf16> -> vector<8x48xbf16>
    %cst_74 = arith.constant dense<0.000000e+00> : vector<8x128xf32>
    %174 = tpu.matmul %173, %3, %cst_74 {dimension_numbers = #tpu.dot_dimension_numbers<[1], [0], [0], [1], [0, 0, 1, 1], [], []>} : vector<8x48xbf16>, vector<48x128xbf16>, vector<8x128xf32> -> vector<8x128xf32>
    %175 = arith.addf %174, %6 : vector<8x128xf32>
    %176 = vector.extract_strided_slice %175 {offsets = [0, 0], sizes = [8, 32], strides = [1, 1]} : vector<8x128xf32> to vector<8x32xf32>
    %177 = arith.negf %176 : vector<8x32xf32>
    %178 = math.exp %177 : vector<8x32xf32>
    %cst_75 = arith.constant 1.000000e+00 : f32
    %179 = vector.broadcast %cst_75 : f32 to vector<8x32xf32>
    %180 = arith.addf %179, %178 : vector<8x32xf32>
    %181 = arith.divf %179, %180 : vector<8x32xf32>
    %182 = vector.extract_strided_slice %175 {offsets = [0, 32], sizes = [8, 32], strides = [1, 1]} : vector<8x128xf32> to vector<8x32xf32>
    %183 = arith.negf %182 : vector<8x32xf32>
    %184 = math.exp %183 : vector<8x32xf32>
    %cst_76 = arith.constant 1.000000e+00 : f32
    %185 = vector.broadcast %cst_76 : f32 to vector<8x32xf32>
    %186 = arith.addf %185, %184 : vector<8x32xf32>
    %187 = arith.divf %185, %186 : vector<8x32xf32>
    %188 = vector.extract_strided_slice %175 {offsets = [0, 64], sizes = [8, 32], strides = [1, 1]} : vector<8x128xf32> to vector<8x32xf32>
    %189 = math.tanh %188 : vector<8x32xf32>
    %190 = vector.extract_strided_slice %175 {offsets = [0, 96], sizes = [8, 32], strides = [1, 1]} : vector<8x128xf32> to vector<8x32xf32>
    %191 = arith.negf %190 : vector<8x32xf32>
    %192 = math.exp %191 : vector<8x32xf32>
    %cst_77 = arith.constant 1.000000e+00 : f32
    %193 = vector.broadcast %cst_77 : f32 to vector<8x32xf32>
    %194 = arith.addf %193, %192 : vector<8x32xf32>
    %195 = arith.divf %193, %194 : vector<8x32xf32>
    %196 = arith.mulf %187, %171 : vector<8x32xf32>
    %197 = arith.mulf %181, %189 : vector<8x32xf32>
    %198 = arith.addf %196, %197 : vector<8x32xf32>
    %199 = math.tanh %198 : vector<8x32xf32>
    %200 = arith.mulf %195, %199 : vector<8x32xf32>
    %c0_78 = arith.constant 0 : index
    %c0_79 = arith.constant 0 : index
    %201 = vector.load %arg9[%c0_78, %c0_79] : memref<8x32xf32, #tpu.memory_space<vmem>>, vector<8x32xf32>
    tpu.vector_store %arg9[%c0_78, %c0_79], %198 {strides = array<i32>} : memref<8x32xf32, #tpu.memory_space<vmem>>, vector<8x32xf32>,
    %c0_80 = arith.constant 0 : index
    %c0_81 = arith.constant 0 : index
    %202 = vector.load %arg8[%c0_80, %c0_81] : memref<8x32xf32, #tpu.memory_space<vmem>>, vector<8x32xf32>
    tpu.vector_store %arg8[%c0_80, %c0_81], %200 {strides = array<i32>} : memref<8x32xf32, #tpu.memory_space<vmem>>, vector<8x32xf32>,
    %203 = arith.index_cast %c4_i32 : i32 to index
    %c0_82 = arith.constant 0 : index
    %c0_83 = arith.constant 0 : index
    %204 = vector.load %arg7[%203, %c0_82, %c0_83] : memref<8x8x32xf32, #tpu.memory_space<vmem>>, vector<1x8x32xf32>
    %205 = vector.shape_cast %204 : vector<1x8x32xf32> to vector<8x32xf32>
    %206 = vector.shape_cast %200 : vector<8x32xf32> to vector<1x8x32xf32>
    tpu.vector_store %arg7[%203, %c0_82, %c0_83], %206 {strides = array<i32>} : memref<8x8x32xf32, #tpu.memory_space<vmem>>, vector<1x8x32xf32>,
    %c5_i32 = arith.constant 5 : i32
    %207 = arith.index_cast %c5_i32 : i32 to index
    %c0_84 = arith.constant 0 : index
    %c0_85 = arith.constant 0 : index
    %208 = vector.load %arg2[%207, %c0_84, %c0_85] : memref<8x8x16xbf16, #tpu.memory_space<vmem>>, vector<1x8x16xbf16>
    %209 = vector.shape_cast %208 : vector<1x8x16xbf16> to vector<8x16xbf16>
    %c0_86 = arith.constant 0 : index
    %c0_87 = arith.constant 0 : index
    %210 = vector.load %arg8[%c0_86, %c0_87] : memref<8x32xf32, #tpu.memory_space<vmem>>, vector<8x32xf32>
    %c0_88 = arith.constant 0 : index
    %c0_89 = arith.constant 0 : index
    %211 = vector.load %arg9[%c0_88, %c0_89] : memref<8x32xf32, #tpu.memory_space<vmem>>, vector<8x32xf32>
    %212 = arith.truncf %210 : vector<8x32xf32> to vector<8x32xbf16>
    %213 = tpu.concatenate %209, %212 in 1 : vector<8x16xbf16>, vector<8x32xbf16> -> vector<8x48xbf16>
    %cst_90 = arith.constant dense<0.000000e+00> : vector<8x128xf32>
    %214 = tpu.matmul %213, %3, %cst_90 {dimension_numbers = #tpu.dot_dimension_numbers<[1], [0], [0], [1], [0, 0, 1, 1], [], []>} : vector<8x48xbf16>, vector<48x128xbf16>, vector<8x128xf32> -> vector<8x128xf32>
    %215 = arith.addf %214, %6 : vector<8x128xf32>
    %216 = vector.extract_strided_slice %215 {offsets = [0, 0], sizes = [8, 32], strides = [1, 1]} : vector<8x128xf32> to vector<8x32xf32>
    %217 = arith.negf %216 : vector<8x32xf32>
    %218 = math.exp %217 : vector<8x32xf32>
    %cst_91 = arith.constant 1.000000e+00 : f32
    %219 = vector.broadcast %cst_91 : f32 to vector<8x32xf32>
    %220 = arith.addf %219, %218 : vector<8x32xf32>
    %221 = arith.divf %219, %220 : vector<8x32xf32>
    %222 = vector.extract_strided_slice %215 {offsets = [0, 32], sizes = [8, 32], strides = [1, 1]} : vector<8x128xf32> to vector<8x32xf32>
    %223 = arith.negf %222 : vector<8x32xf32>
    %224 = math.exp %223 : vector<8x32xf32>
    %cst_92 = arith.constant 1.000000e+00 : f32
    %225 = vector.broadcast %cst_92 : f32 to vector<8x32xf32>
    %226 = arith.addf %225, %224 : vector<8x32xf32>
    %227 = arith.divf %225, %226 : vector<8x32xf32>
    %228 = vector.extract_strided_slice %215 {offsets = [0, 64], sizes = [8, 32], strides = [1, 1]} : vector<8x128xf32> to vector<8x32xf32>
    %229 = math.tanh %228 : vector<8x32xf32>
    %230 = vector.extract_strided_slice %215 {offsets = [0, 96], sizes = [8, 32], strides = [1, 1]} : vector<8x128xf32> to vector<8x32xf32>
    %231 = arith.negf %230 : vector<8x32xf32>
    %232 = math.exp %231 : vector<8x32xf32>
    %cst_93 = arith.constant 1.000000e+00 : f32
    %233 = vector.broadcast %cst_93 : f32 to vector<8x32xf32>
    %234 = arith.addf %233, %232 : vector<8x32xf32>
    %235 = arith.divf %233, %234 : vector<8x32xf32>
    %236 = arith.mulf %227, %211 : vector<8x32xf32>
    %237 = arith.mulf %221, %229 : vector<8x32xf32>
    %238 = arith.addf %236, %237 : vector<8x32xf32>
    %239 = math.tanh %238 : vector<8x32xf32>
    %240 = arith.mulf %235, %239 : vector<8x32xf32>
    %c0_94 = arith.constant 0 : index
    %c0_95 = arith.constant 0 : index
    %241 = vector.load %arg9[%c0_94, %c0_95] : memref<8x32xf32, #tpu.memory_space<vmem>>, vector<8x32xf32>
    tpu.vector_store %arg9[%c0_94, %c0_95], %238 {strides = array<i32>} : memref<8x32xf32, #tpu.memory_space<vmem>>, vector<8x32xf32>,
    %c0_96 = arith.constant 0 : index
    %c0_97 = arith.constant 0 : index
    %242 = vector.load %arg8[%c0_96, %c0_97] : memref<8x32xf32, #tpu.memory_space<vmem>>, vector<8x32xf32>
    tpu.vector_store %arg8[%c0_96, %c0_97], %240 {strides = array<i32>} : memref<8x32xf32, #tpu.memory_space<vmem>>, vector<8x32xf32>,
    %243 = arith.index_cast %c5_i32 : i32 to index
    %c0_98 = arith.constant 0 : index
    %c0_99 = arith.constant 0 : index
    %244 = vector.load %arg7[%243, %c0_98, %c0_99] : memref<8x8x32xf32, #tpu.memory_space<vmem>>, vector<1x8x32xf32>
    %245 = vector.shape_cast %244 : vector<1x8x32xf32> to vector<8x32xf32>
    %246 = vector.shape_cast %240 : vector<8x32xf32> to vector<1x8x32xf32>
    tpu.vector_store %arg7[%243, %c0_98, %c0_99], %246 {strides = array<i32>} : memref<8x8x32xf32, #tpu.memory_space<vmem>>, vector<1x8x32xf32>,
    %c6_i32 = arith.constant 6 : i32
    %247 = arith.index_cast %c6_i32 : i32 to index
    %c0_100 = arith.constant 0 : index
    %c0_101 = arith.constant 0 : index
    %248 = vector.load %arg2[%247, %c0_100, %c0_101] : memref<8x8x16xbf16, #tpu.memory_space<vmem>>, vector<1x8x16xbf16>
    %249 = vector.shape_cast %248 : vector<1x8x16xbf16> to vector<8x16xbf16>
    %c0_102 = arith.constant 0 : index
    %c0_103 = arith.constant 0 : index
    %250 = vector.load %arg8[%c0_102, %c0_103] : memref<8x32xf32, #tpu.memory_space<vmem>>, vector<8x32xf32>
    %c0_104 = arith.constant 0 : index
    %c0_105 = arith.constant 0 : index
    %251 = vector.load %arg9[%c0_104, %c0_105] : memref<8x32xf32, #tpu.memory_space<vmem>>, vector<8x32xf32>
    %252 = arith.truncf %250 : vector<8x32xf32> to vector<8x32xbf16>
    %253 = tpu.concatenate %249, %252 in 1 : vector<8x16xbf16>, vector<8x32xbf16> -> vector<8x48xbf16>
    %cst_106 = arith.constant dense<0.000000e+00> : vector<8x128xf32>
    %254 = tpu.matmul %253, %3, %cst_106 {dimension_numbers = #tpu.dot_dimension_numbers<[1], [0], [0], [1], [0, 0, 1, 1], [], []>} : vector<8x48xbf16>, vector<48x128xbf16>, vector<8x128xf32> -> vector<8x128xf32>
    %255 = arith.addf %254, %6 : vector<8x128xf32>
    %256 = vector.extract_strided_slice %255 {offsets = [0, 0], sizes = [8, 32], strides = [1, 1]} : vector<8x128xf32> to vector<8x32xf32>
    %257 = arith.negf %256 : vector<8x32xf32>
    %258 = math.exp %257 : vector<8x32xf32>
    %cst_107 = arith.constant 1.000000e+00 : f32
    %259 = vector.broadcast %cst_107 : f32 to vector<8x32xf32>
    %260 = arith.addf %259, %258 : vector<8x32xf32>
    %261 = arith.divf %259, %260 : vector<8x32xf32>
    %262 = vector.extract_strided_slice %255 {offsets = [0, 32], sizes = [8, 32], strides = [1, 1]} : vector<8x128xf32> to vector<8x32xf32>
    %263 = arith.negf %262 : vector<8x32xf32>
    %264 = math.exp %263 : vector<8x32xf32>
    %cst_108 = arith.constant 1.000000e+00 : f32
    %265 = vector.broadcast %cst_108 : f32 to vector<8x32xf32>
    %266 = arith.addf %265, %264 : vector<8x32xf32>
    %267 = arith.divf %265, %266 : vector<8x32xf32>
    %268 = vector.extract_strided_slice %255 {offsets = [0, 64], sizes = [8, 32], strides = [1, 1]} : vector<8x128xf32> to vector<8x32xf32>
    %269 = math.tanh %268 : vector<8x32xf32>
    %270 = vector.extract_strided_slice %255 {offsets = [0, 96], sizes = [8, 32], strides = [1, 1]} : vector<8x128xf32> to vector<8x32xf32>
    %271 = arith.negf %270 : vector<8x32xf32>
    %272 = math.exp %271 : vector<8x32xf32>
    %cst_109 = arith.constant 1.000000e+00 : f32
    %273 = vector.broadcast %cst_109 : f32 to vector<8x32xf32>
    %274 = arith.addf %273, %272 : vector<8x32xf32>
    %275 = arith.divf %273, %274 : vector<8x32xf32>
    %276 = arith.mulf %267, %251 : vector<8x32xf32>
    %277 = arith.mulf %261, %269 : vector<8x32xf32>
    %278 = arith.addf %276, %277 : vector<8x32xf32>
    %279 = math.tanh %278 : vector<8x32xf32>
    %280 = arith.mulf %275, %279 : vector<8x32xf32>
    %c0_110 = arith.constant 0 : index
    %c0_111 = arith.constant 0 : index
    %281 = vector.load %arg9[%c0_110, %c0_111] : memref<8x32xf32, #tpu.memory_space<vmem>>, vector<8x32xf32>
    tpu.vector_store %arg9[%c0_110, %c0_111], %278 {strides = array<i32>} : memref<8x32xf32, #tpu.memory_space<vmem>>, vector<8x32xf32>,
    %c0_112 = arith.constant 0 : index
    %c0_113 = arith.constant 0 : index
    %282 = vector.load %arg8[%c0_112, %c0_113] : memref<8x32xf32, #tpu.memory_space<vmem>>, vector<8x32xf32>
    tpu.vector_store %arg8[%c0_112, %c0_113], %280 {strides = array<i32>} : memref<8x32xf32, #tpu.memory_space<vmem>>, vector<8x32xf32>,
    %283 = arith.index_cast %c6_i32 : i32 to index
    %c0_114 = arith.constant 0 : index
    %c0_115 = arith.constant 0 : index
    %284 = vector.load %arg7[%283, %c0_114, %c0_115] : memref<8x8x32xf32, #tpu.memory_space<vmem>>, vector<1x8x32xf32>
    %285 = vector.shape_cast %284 : vector<1x8x32xf32> to vector<8x32xf32>
    %286 = vector.shape_cast %280 : vector<8x32xf32> to vector<1x8x32xf32>
    tpu.vector_store %arg7[%283, %c0_114, %c0_115], %286 {strides = array<i32>} : memref<8x8x32xf32, #tpu.memory_space<vmem>>, vector<1x8x32xf32>,
    %c7_i32 = arith.constant 7 : i32
    %287 = arith.index_cast %c7_i32 : i32 to index
    %c0_116 = arith.constant 0 : index
    %c0_117 = arith.constant 0 : index
    %288 = vector.load %arg2[%287, %c0_116, %c0_117] : memref<8x8x16xbf16, #tpu.memory_space<vmem>>, vector<1x8x16xbf16>
    %289 = vector.shape_cast %288 : vector<1x8x16xbf16> to vector<8x16xbf16>
    %c0_118 = arith.constant 0 : index
    %c0_119 = arith.constant 0 : index
    %290 = vector.load %arg8[%c0_118, %c0_119] : memref<8x32xf32, #tpu.memory_space<vmem>>, vector<8x32xf32>
    %c0_120 = arith.constant 0 : index
    %c0_121 = arith.constant 0 : index
    %291 = vector.load %arg9[%c0_120, %c0_121] : memref<8x32xf32, #tpu.memory_space<vmem>>, vector<8x32xf32>
    %292 = arith.truncf %290 : vector<8x32xf32> to vector<8x32xbf16>
    %293 = tpu.concatenate %289, %292 in 1 : vector<8x16xbf16>, vector<8x32xbf16> -> vector<8x48xbf16>
    %cst_122 = arith.constant dense<0.000000e+00> : vector<8x128xf32>
    %294 = tpu.matmul %293, %3, %cst_122 {dimension_numbers = #tpu.dot_dimension_numbers<[1], [0], [0], [1], [0, 0, 1, 1], [], []>} : vector<8x48xbf16>, vector<48x128xbf16>, vector<8x128xf32> -> vector<8x128xf32>
    %295 = arith.addf %294, %6 : vector<8x128xf32>
    %296 = vector.extract_strided_slice %295 {offsets = [0, 0], sizes = [8, 32], strides = [1, 1]} : vector<8x128xf32> to vector<8x32xf32>
    %297 = arith.negf %296 : vector<8x32xf32>
    %298 = math.exp %297 : vector<8x32xf32>
    %cst_123 = arith.constant 1.000000e+00 : f32
    %299 = vector.broadcast %cst_123 : f32 to vector<8x32xf32>
    %300 = arith.addf %299, %298 : vector<8x32xf32>
    %301 = arith.divf %299, %300 : vector<8x32xf32>
    %302 = vector.extract_strided_slice %295 {offsets = [0, 32], sizes = [8, 32], strides = [1, 1]} : vector<8x128xf32> to vector<8x32xf32>
    %303 = arith.negf %302 : vector<8x32xf32>
    %304 = math.exp %303 : vector<8x32xf32>
    %cst_124 = arith.constant 1.000000e+00 : f32
    %305 = vector.broadcast %cst_124 : f32 to vector<8x32xf32>
    %306 = arith.addf %305, %304 : vector<8x32xf32>
    %307 = arith.divf %305, %306 : vector<8x32xf32>
    %308 = vector.extract_strided_slice %295 {offsets = [0, 64], sizes = [8, 32], strides = [1, 1]} : vector<8x128xf32> to vector<8x32xf32>
    %309 = math.tanh %308 : vector<8x32xf32>
    %310 = vector.extract_strided_slice %295 {offsets = [0, 96], sizes = [8, 32], strides = [1, 1]} : vector<8x128xf32> to vector<8x32xf32>
    %311 = arith.negf %310 : vector<8x32xf32>
    %312 = math.exp %311 : vector<8x32xf32>
    %cst_125 = arith.constant 1.000000e+00 : f32
    %313 = vector.broadcast %cst_125 : f32 to vector<8x32xf32>
    %314 = arith.addf %313, %312 : vector<8x32xf32>
    %315 = arith.divf %313, %314 : vector<8x32xf32>
    %316 = arith.mulf %307, %291 : vector<8x32xf32>
    %317 = arith.mulf %301, %309 : vector<8x32xf32>
    %318 = arith.addf %316, %317 : vector<8x32xf32>
    %319 = math.tanh %318 : vector<8x32xf32>
    %320 = arith.mulf %315, %319 : vector<8x32xf32>
    %c0_126 = arith.constant 0 : index
    %c0_127 = arith.constant 0 : index
    %321 = vector.load %arg9[%c0_126, %c0_127] : memref<8x32xf32, #tpu.memory_space<vmem>>, vector<8x32xf32>
    tpu.vector_store %arg9[%c0_126, %c0_127], %318 {strides = array<i32>} : memref<8x32xf32, #tpu.memory_space<vmem>>, vector<8x32xf32>,
    %c0_128 = arith.constant 0 : index
    %c0_129 = arith.constant 0 : index
    %322 = vector.load %arg8[%c0_128, %c0_129] : memref<8x32xf32, #tpu.memory_space<vmem>>, vector<8x32xf32>
    tpu.vector_store %arg8[%c0_128, %c0_129], %320 {strides = array<i32>} : memref<8x32xf32, #tpu.memory_space<vmem>>, vector<8x32xf32>,
    %323 = arith.index_cast %c7_i32 : i32 to index
    %c0_130 = arith.constant 0 : index
    %c0_131 = arith.constant 0 : index
    %324 = vector.load %arg7[%323, %c0_130, %c0_131] : memref<8x8x32xf32, #tpu.memory_space<vmem>>, vector<1x8x32xf32>
    %325 = vector.shape_cast %324 : vector<1x8x32xf32> to vector<8x32xf32>
    %326 = vector.shape_cast %320 : vector<8x32xf32> to vector<1x8x32xf32>
    tpu.vector_store %arg7[%323, %c0_130, %c0_131], %326 {strides = array<i32>} : memref<8x8x32xf32, #tpu.memory_space<vmem>>, vector<1x8x32xf32>,
    %c8_i32 = arith.constant 8 : i32
    return
  }
  func.func @transform_0(%arg0: i32, %arg1: i32) -> (i32, i32, i32) {
    %c0_i32 = arith.constant 0 : i32
    %c0_i32_0 = arith.constant 0 : i32
    return %arg1, %arg0, %c0_i32 : i32, i32, i32
  }
  func.func @transform_1(%arg0: i32, %arg1: i32) -> (i32, i32) {
    %c0_i32 = arith.constant 0 : i32
    %c0_i32_0 = arith.constant 0 : i32
    return %arg0, %c0_i32 : i32, i32
  }
  func.func @transform_2(%arg0: i32, %arg1: i32) -> (i32, i32) {
    %c0_i32 = arith.constant 0 : i32
    %c0_i32_0 = arith.constant 0 : i32
    return %arg0, %c0_i32 : i32, i32
  }
  func.func @transform_3(%arg0: i32, %arg1: i32) -> (i32, i32) {
    %c0_i32 = arith.constant 0 : i32
    %c0_i32_0 = arith.constant 0 : i32
    %c0_i32_1 = arith.constant 0 : i32
    return %c0_i32, %c0_i32_0 : i32, i32
  }
  func.func @transform_4(%arg0: i32, %arg1: i32) -> (i32, i32) {
    %c0_i32 = arith.constant 0 : i32
    %c0_i32_0 = arith.constant 0 : i32
    %c0_i32_1 = arith.constant 0 : i32
    return %c0_i32, %c0_i32_0 : i32, i32
  }
  func.func @transform_5(%arg0: i32, %arg1: i32) -> (i32, i32, i32) {
    %c0_i32 = arith.constant 0 : i32
    %c0_i32_0 = arith.constant 0 : i32
    return %arg1, %arg0, %c0_i32 : i32, i32, i32
  }
}

</mosaic_0001>

<bundles_post_ra>
// kernel: tpu_custom_call.1
= control target key start
LH: loop header
LB: loop body
LE: loop exit
PB: predicated region body
PF: predicated region fallthrough
CT: control target
= control target key end

     0   :  { %10 = vsyncpa [#allocation5], 0  ;;  %s1513_s0 = inlined_call_operand.hbm [shape: bf16[8,8,16], index: 0, kind: input, shape index: {}]   ;;  %s1514_s1 = inlined_call_operand.hbm [shape: f32[8,32], index: 1, kind: input, shape index: {}]   ;;  %s1515_s2 = inlined_call_operand.hbm [shape: f32[8,32], index: 2, kind: input, shape index: {}]   ;;  %s1516_s3 = inlined_call_operand.hbm [shape: bf16[48,128], index: 3, kind: input, shape index: {}]   ;;  %s1517_s4 = inlined_call_operand.vmem [shape: f32[1,128], index: 4, kind: input, shape index: {}]   ;;  %s1518_s5 = inlined_call_operand.hbm [shape: f32[8,8,32], index: 5, kind: output, shape index: {}]  }
   0x1   :  { %11 = vsyncpa [#allocation8], 0 }
   0x2   :  { %12 = vsyncpa [#allocation11], 0 }
   0x3   :  { %13 = vsyncpa [#allocation6], 0  ;;  %s1208_s18 = smov [#allocation7]   ;;  %s1209_s20 = smov [#allocation4]  }
   0x4   :  { %s32_s19 = sshll.u32 %s1208_s18, 4  ;;  %s19_s21 = sshll.u32 %s1209_s20, 4  ;;  %s33_s19 = int_to_ptr.vmem [resolvable:$true] %s32_s19  ;;  %s1252_s21 = int_to_ptr.vmem [resolvable:$true] %s19_s21 }
   0x5   :  { %s1090_s24 = scalar_lea.hbm %s1514_s1, 128 }
   0x6   :  { %p1091_p0 = scmp.ne.s32.totalorder %s1514_s1, %s1090_s24  ;;  %p1094_p1 = scmp.lt.u32.totalorder %s1090_s24, %s1514_s1 }
   0x8   :  { %p1096_p2 = pnand %p1094_p1, %p1091_p0 }
   0xa   :  { %1099 = shalt.err (!%p1096_p2)
}
   0xb   :  { %s1100_s29 = scalar_lea.vmem %s33_s19, 128  ;;  %p1105_p4 = scmp.lt.s32.totalorder %s33_s19, %s33_s19 }
   0xc   :  { %p1101_p3 = scmp.ne.s32.totalorder %s33_s19, %s1100_s29  ;;  %p1106_p5 = scmp.lt.s32.totalorder %s1100_s29, %s1100_s29 }
   0xe   :  { %p1107_p6 = por %p1106_p5, %p1105_p4 }
  0x10   :  { %p1108_p7 = pnand %p1107_p6, %p1101_p3 }
  0x12   :  { %1111 = shalt.err (!%p1108_p7)
}
  0x13   :  { %35 = dma.hbm_to_vmem [thread:$0]  %s1514_s1, 128, %s33_s19, [#allocation8]  }
  0x14   :  { %s1112_s9 = scalar_lea.hbm %s1513_s0, 512 }
  0x15   :  { %p1113_p8 = scmp.ne.s32.totalorder %s1513_s0, %s1112_s9  ;;  %p1116_p9 = scmp.lt.u32.totalorder %s1112_s9, %s1513_s0 }
  0x17   :  { %p1118_p10 = pnand %p1116_p9, %p1113_p8 }
  0x19   :  { %1121 = shalt.err (!%p1118_p10)
}
  0x1a   :  { %s1122_s14 = scalar_lea.vmem %s1252_s21, 512  ;;  %p1127_p12 = scmp.lt.s32.totalorder %s1252_s21, %s1252_s21 }
  0x1b   :  { %p1123_p11 = scmp.ne.s32.totalorder %s1252_s21, %s1122_s14  ;;  %p1128_p13 = scmp.lt.s32.totalorder %s1122_s14, %s1122_s14 }
  0x1d   :  { %p1129_p0 = por %p1128_p13, %p1127_p12 }
  0x1f   :  { %p1130_p1 = pnand %p1129_p0, %p1123_p11 }
  0x21   :  { %1133 = shalt.err (!%p1130_p1)
}
  0x22   :  { %s1210_s1 = smov 64   ;;  %s1211_s15 = smov 4  }
  0x23   :  { %25 = dma.hbm_to_vmem [thread:$0]  %s1513_s0, 512, %s1252_s21, [#allocation5], %s1210_s1, %s1210_s1, %s1211_s15  }
  0x24   :  { %s1212_s18 = smov [#allocation9]   ;;  %s1213_s20 = smov [#allocation10]  }
  0x25   :  { %s42_s19 = sshll.u32 %s1212_s18, 4  ;;  %s51_s22 = sshll.u32 %s1213_s20, 4  ;;  %s43_s19 = int_to_ptr.vmem [resolvable:$true] %s42_s19  ;;  %s1286_s22 = int_to_ptr.vmem [resolvable:$true] %s51_s22 }
  0x26   :  { %s1134_s25 = scalar_lea.hbm %s1515_s2, 128 }
  0x27   :  { %p1135_p2 = scmp.ne.s32.totalorder %s1515_s2, %s1134_s25  ;;  %p1138_p3 = scmp.lt.u32.totalorder %s1134_s25, %s1515_s2 }
  0x29   :  { %p1140_p4 = pnand %p1138_p3, %p1135_p2 }
  0x2b   :  { %1143 = shalt.err (!%p1140_p4)
}
  0x2c   :  { %s1144_s0 = scalar_lea.vmem %s43_s19, 128  ;;  %p1149_p6 = scmp.lt.s32.totalorder %s43_s19, %s43_s19 }
  0x2d   :  { %p1145_p5 = scmp.ne.s32.totalorder %s43_s19, %s1144_s0  ;;  %p1150_p7 = scmp.lt.s32.totalorder %s1144_s0, %s1144_s0 }
  0x2f   :  { %p1151_p8 = por %p1150_p7, %p1149_p6 }
  0x31   :  { %p1152_p9 = pnand %p1151_p8, %p1145_p5 }
  0x33   :  { %1155 = shalt.err (!%p1152_p9)
}
  0x34   :  { %45 = dma.hbm_to_vmem [thread:$0]  %s1515_s2, 128, %s43_s19, [#allocation8]  }
  0x35   :  { %s1156_s8 = scalar_lea.hbm %s1516_s3, 384 }
  0x36   :  { %p1157_p10 = scmp.ne.s32.totalorder %s1516_s3, %s1156_s8  ;;  %p1160_p11 = scmp.lt.u32.totalorder %s1156_s8, %s1516_s3 }
  0x38   :  { %p1162_p12 = pnand %p1160_p11, %p1157_p10 }
  0x3a   :  { %1165 = shalt.err (!%p1162_p12)
}
  0x3b   :  { %s1166_s13 = scalar_lea.vmem %s1286_s22, 384  ;;  %p1171_p0 = scmp.lt.s32.totalorder %s1286_s22, %s1286_s22 }
  0x3c   :  { %p1167_p13 = scmp.ne.s32.totalorder %s1286_s22, %s1166_s13  ;;  %p1172_p1 = scmp.lt.s32.totalorder %s1166_s13, %s1166_s13 }
  0x3e   :  { %p1173_p2 = por %p1172_p1, %p1171_p0 }
  0x40   :  { %p1174_p3 = pnand %p1173_p2, %p1167_p13 }
  0x42   :  { %1177 = shalt.err (!%p1174_p3)
}
  0x43   :  { %57 = dma.hbm_to_vmem [thread:$0]  %s1516_s3, 384, %s1286_s22, [#allocation11], %s1210_s1, %s1210_s1, %s1211_s15  }
  0x44   :  { %1200 = dma.done.wait [#allocation5], 512  }
  0x45   :  { %1201 = vsyncadd [#allocation5], 4294966784 }
  0x46   :  { %1202 = dma.done.wait [#allocation8], 256  }
  0x47   :  { %1203 = vsyncadd [#allocation8], 4294967040 }
  0x48   :  { %1204 = dma.done.wait [#allocation11], 384  }
  0x49   :  { %1205 = vsyncadd [#allocation11], 4294966912  ;;  %v1214_v0 = vmov 0.0   ;;  %vm78_vm0 = vcmask 261120   ;;  %vm1215_vm1 = vmmov 0   ;;  %v77_v1 = vld [vmem:[#allocation7] sm:$0xff] }
  0x4a   :  { %929 = vmatprep.subr.bf16.mxu0 %v1214_v0  ;;  %939 = vmatprep.subr.bf16.mxu1 %v1214_v0  ;;  %79 = vst.msk [vmem:[#allocation2] sm:$0xff] %vm78_vm0, %v77_v1  ;;  %v1327_v2 = vld [vmem:[#allocation10] sm:$0xff]   ;;  %v1330_v3 = vld [vmem:[#allocation10 + $0x8] sm:$0xff]   ;;  %v80_v4 = vld [vmem:[#allocation9] sm:$0xff]  ;;  %s1216_s3 = smov 16   ;;  %s1217_s15 = smov 32  }
  0x4b   :  { %935 = vmatprep.mubr.msk.bf16.mxu0 %vm1215_vm1, %v1214_v0  ;;  %945 = vmatprep.mubr.msk.bf16.mxu1 %vm1215_vm1, %v1214_v0  ;;  %81 = vst.msk [vmem:[#allocation3] sm:$0xff] %vm78_vm0, %v80_v4  ;;  %v1337_v5 = vld [vmem:[#allocation10 + $0x10] sm:$0xff]   ;;  %vm102_vm2 = vcmask 130048   ;;  %vm124_vm3 = vcmask 392192   ;;  %v1361_v12 = vld [vmem:[%s1517_s4] ss:$0 sm:$0xff] }
  0x4c   :  { %930 = vmatpush3.bf16.msra.mxu0 %v1327_v2  ;;  %940 = vmatpush3.bf16.msra.mxu1 %v1327_v2  ;;  %v95_v9 = vld [vmem:[#allocation4] sm:$0xf]  ;;  %s1218_s4 = smov 96   ;;  %v208_v37 = vld [vmem:[#allocation4 + $0x4] sm:$0xf]  ;;  %s1219_s18 = smov [#allocation12]  }
  0x4d   :  { %931 = vmatprep.subr.bf16.mxu0 %v1214_v0  ;;  %941 = vmatprep.subr.bf16.mxu1 %v1214_v0  ;;  %v301_v1 = vld [vmem:[#allocation4 + $0x8] sm:$0xf]  ;;  %s863_s19 = sshll.u32 %s1219_s18, 4  ;;  %s864_s19 = int_to_ptr.vmem [resolvable:$true] %s863_s19 }
  0x4e   :  { %s1178_s20 = scalar_lea.vmem %s864_s19, 1024  ;;  %p1183_p5 = scmp.lt.s32.totalorder %s864_s19, %s864_s19 }
  0x4f   :  { %p1179_p4 = scmp.ne.s32.totalorder %s864_s19, %s1178_s20  ;;  %p1184_p6 = scmp.lt.s32.totalorder %s1178_s20, %s1178_s20 }
  0x50   :  { %932 = vmatpush3.bf16.msra.mxu0 %v1330_v3  ;;  %942 = vmatpush3.bf16.msra.mxu1 %v1330_v3 }
  0x51   :  { %v96_v6 = vld [vmem:[#allocation2] sm:$0xff]  ;;  %933 = vmatprep.subr.bf16.mxu0 %v1214_v0  ;;  %943 = vmatprep.subr.bf16.mxu1 %v1214_v0  ;;  %p1185_p7 = por %p1184_p6, %p1183_p5 }
  0x52   :  { %v98_v7 = vpack.c.bf16 %v96_v6, %v96_v6  ;;  %v97_v8 = vld [vmem:[#allocation3] sm:$0xff] }
  0x53   :  { %175 = vrot.lane.b32.xlu1 %v97_v8, %s1217_s15  ;;  %p1186_p8 = pnand %p1185_p7, %p1179_p4 }
  0x54   :  { %100 = vrot.lane.b32.xlu0 %v98_v7, %s1216_s3  ;;  %934 = vmatpush3.bf16.msra.mxu0 %v1337_v5 }
  0x55   :  { %944 = vmatpush3.bf16.msra.mxu1 %v1337_v5  ;;  %949 = vmatprep.subr.bf16.mxu0 %v1214_v0 }
  0x56   :  { %959 = vmatprep.subr.bf16.mxu1 %v1214_v0 }
  0xc5   :  { %v176_v25 = vpop.permute.xlu1 %175 }
  0xc6   :  { %v101_v10 = vpop.permute.xlu0 %100 }
  0xc7   :  { %v105_v11 = vsel %vm102_vm2, %v95_v9, %v101_v10 }
  0xc8   :  { %936 = vmatmul.mubr.msk.bf16.vlgmr.msra.gmra.mrb[0].mxu0 %vm124_vm3, %v105_v11 }
  0xc9   :  { %950 = vmatpush3.bf16.msra.mxu0 %v1327_v2  ;;  %955 = vmatprep.mubr.msk.bf16.mxu0 %vm1215_vm1, %v1214_v0 }
  0xca   :  { %951 = vmatprep.subr.bf16.mxu0 %v1214_v0 }
  0xcd   :  { %952 = vmatpush3.bf16.msra.mxu0 %v1330_v3 }
  0xce   :  { %953 = vmatprep.subr.bf16.mxu0 %v1214_v0 }
  0xd1   :  { %954 = vmatpush3.bf16.msra.mxu0 %v1337_v5 }
  0xd2   :  { %969 = vmatprep.subr.bf16.mxu0 %v1214_v0 }
 0x19b   :  { %v161_v13 = vpop.f32.mrb[0].mxu0 }
 0x19c   :  { %v162_v14 = vadd.f32 %v1361_v12, %v161_v13  ;;  %v937_v15 = vpop.f32.mrb[1].mxu0 }
 0x19d   :  { %v164_v16 = vpop.f32.mrb[2].mxu0 }
 0x19e   :  { %1026 = vtanh.f32 %v162_v14  ;;  %v938_v17 = vpop.f32.mrb[3].mxu0  ;;  %v882_v19 = vmul.f32 -1.442695, %v162_v14 }
 0x1a0   :  { %1028 = vpow2.f32 %v882_v19 }
 0x1a8   :  { %v1027_v18 = vpop.eup %1026 }
 0x1a9   :  { %180 = vrot.lane.b32.xlu0 %v1027_v18, %s1210_s1 }
 0x1aa   :  { %v1029_v20 = vpop.eup %1028 }
 0x1ab   :  { %v170_v21 = vadd.f32 1.0, %v1029_v20 }
 0x1ad   :  { %1030 = vrcp.f32 %v170_v21 }
 0x1b7   :  { %v1031_v22 = vpop.eup %1030 }
 0x1b8   :  { %v178_v26 = vmul.f32 %v1031_v22, %v176_v25 }
 0x21b   :  { %v181_v23 = vpop.permute.xlu0 %180 }
 0x21c   :  { %v183_v24 = vmul.f32 %v1031_v22, %v181_v23 }
 0x21e   :  { %185 = vrot.lane.b32.xlu1 %v183_v24, %s1217_s15 }
 0x290   :  { %v186_v27 = vpop.permute.xlu1 %185 }
 0x291   :  { %v188_v28 = vadd.f32 %v186_v27, %v178_v26 }
 0x293   :  { %1032 = vtanh.f32 %v188_v28 }
 0x29d   :  { %v1033_v29 = vpop.eup %1032 }
 0x29e   :  { %191 = vrot.lane.b32.xlu0 %v1033_v29, %s1210_s1 }
 0x310   :  { %v192_v30 = vpop.permute.xlu0 %191 }
 0x311   :  { %v194_v31 = vmul.f32 %v1031_v22, %v192_v30 }
 0x313   :  { %202 = vrot.lane.b32.xlu1 %v194_v31, %s1217_s15 }
 0x317   :  { %196 = vrot.lane.b32.xlu1 %v188_v28, %s1218_s4 }
 0x385   :  { %v203_v32 = vpop.permute.xlu1 %202 }
 0x386   :  { %205 = vst.msk [vmem:[#allocation2] sm:$0xff] %vm78_vm0, %v203_v32  ;;  %206 = vst.msk [vmem:[#allocation12] sm:$0xff] %vm78_vm0, %v203_v32  ;;  %v394_v32 = vld [vmem:[#allocation4 + $0xc] sm:$0xf] }
 0x389   :  { %v197_v33 = vpop.permute.xlu1 %196 }
 0x38a   :  { %200 = vst.msk [vmem:[#allocation3] sm:$0xff] %vm78_vm0, %v197_v33 }
 0x38d   :  { %v209_v34 = vld [vmem:[#allocation2] sm:$0xff] }
 0x38e   :  { %v211_v35 = vpack.c.bf16 %v209_v34, %v209_v34 }
 0x390   :  { %213 = vrot.lane.b32.xlu0 %v211_v35, %s1216_s3 }
 0x391   :  { %v210_v36 = vld [vmem:[#allocation3] sm:$0xff] }
 0x392   :  { %268 = vrot.lane.b32.xlu1 %v210_v36, %s1217_s15 }
 0x402   :  { %v214_v38 = vpop.permute.xlu0 %213 }
 0x403   :  { %v217_v39 = vsel %vm102_vm2, %v208_v37, %v214_v38 }
 0x404   :  { %946 = vmatmul.mubr.msk.bf16.vlgmr.msra.gmra.mrb[0].mxu1 %vm124_vm3, %v217_v39  ;;  %v269_v52 = vpop.permute.xlu1 %268 }
 0x405   :  { %960 = vmatpush3.bf16.msra.mxu1 %v1327_v2  ;;  %965 = vmatprep.mubr.msk.bf16.mxu1 %vm1215_vm1, %v1214_v0 }
 0x406   :  { %961 = vmatprep.subr.bf16.mxu1 %v1214_v0 }
 0x409   :  { %962 = vmatpush3.bf16.msra.mxu1 %v1330_v3 }
 0x40a   :  { %963 = vmatprep.subr.bf16.mxu1 %v1214_v0 }
 0x40d   :  { %964 = vmatpush3.bf16.msra.mxu1 %v1337_v5 }
 0x40e   :  { %979 = vmatprep.subr.bf16.mxu1 %v1214_v0 }
 0x4d7   :  { %v254_v40 = vpop.f32.mrb[0].mxu1 }
 0x4d8   :  { %v255_v41 = vadd.f32 %v1361_v12, %v254_v40  ;;  %v947_v42 = vpop.f32.mrb[1].mxu1 }
 0x4d9   :  { %v257_v43 = vpop.f32.mrb[2].mxu1 }
 0x4da   :  { %1034 = vtanh.f32 %v255_v41  ;;  %v948_v44 = vpop.f32.mrb[3].mxu1  ;;  %v884_v46 = vmul.f32 -1.442695, %v255_v41 }
 0x4dc   :  { %1036 = vpow2.f32 %v884_v46 }
 0x4e4   :  { %v1035_v45 = vpop.eup %1034 }
 0x4e5   :  { %273 = vrot.lane.b32.xlu0 %v1035_v45, %s1210_s1 }
 0x4e6   :  { %v1037_v47 = vpop.eup %1036 }
 0x4e7   :  { %v263_v48 = vadd.f32 1.0, %v1037_v47 }
 0x4e9   :  { %1038 = vrcp.f32 %v263_v48 }
 0x4f3   :  { %v1039_v49 = vpop.eup %1038 }
 0x4f4   :  { %v271_v53 = vmul.f32 %v1039_v49, %v269_v52 }
 0x557   :  { %v274_v50 = vpop.permute.xlu0 %273 }
 0x558   :  { %v276_v51 = vmul.f32 %v1039_v49, %v274_v50 }
 0x55a   :  { %278 = vrot.lane.b32.xlu0 %v276_v51, %s1217_s15 }
 0x5cc   :  { %v279_v54 = vpop.permute.xlu0 %278 }
 0x5cd   :  { %v281_v55 = vadd.f32 %v279_v54, %v271_v53 }
 0x5cf   :  { %1040 = vtanh.f32 %v281_v55 }
 0x5d9   :  { %v1041_v56 = vpop.eup %1040 }
 0x5da   :  { %284 = vrot.lane.b32.xlu1 %v1041_v56, %s1210_s1 }
 0x64c   :  { %v285_v57 = vpop.permute.xlu1 %284 }
 0x64d   :  { %v287_v58 = vmul.f32 %v1039_v49, %v285_v57 }
 0x64f   :  { %294 = vrot.lane.b32.xlu0 %v287_v58, %s1217_s15 }
 0x653   :  { %289 = vrot.lane.b32.xlu0 %v281_v55, %s1218_s4 }
 0x6c1   :  { %v295_v59 = vpop.permute.xlu0 %294 }
 0x6c2   :  { %297 = vst.msk [vmem:[#allocation2] sm:$0xff] %vm78_vm0, %v295_v59  ;;  %299 = vst.msk [vmem:[#allocation12 + $0x8] sm:$0xff] %vm78_vm0, %v295_v59  ;;  %v487_v59 = vld [vmem:[#allocation4 + $0x10] sm:$0xf] }
 0x6c5   :  { %v290_v60 = vpop.permute.xlu0 %289 }
 0x6c6   :  { %292 = vst.msk [vmem:[#allocation3] sm:$0xff] %vm78_vm0, %v290_v60 }
 0x6c9   :  { %v302_v61 = vld [vmem:[#allocation2] sm:$0xff] }
 0x6ca   :  { %v304_v62 = vpack.c.bf16 %v302_v61, %v302_v61 }
 0x6cc   :  { %306 = vrot.lane.b32.xlu1 %v304_v62, %s1216_s3 }
 0x6cd   :  { %v303_v63 = vld [vmem:[#allocation3] sm:$0xff] }
 0x6ce   :  { %361 = vrot.lane.b32.xlu0 %v303_v63, %s1217_s15 }
 0x73e   :  { %v307_v4 = vpop.permute.xlu1 %306 }
 0x73f   :  { %v310_v6 = vsel %vm102_vm2, %v301_v1, %v307_v4 }
 0x740   :  { %956 = vmatmul.mubr.msk.bf16.vlgmr.msra.gmra.mrb[4].mxu0 %vm124_vm3, %v310_v6  ;;  %v362_v20 = vpop.permute.xlu0 %361 }
 0x741   :  { %970 = vmatpush3.bf16.msra.mxu0 %v1327_v2  ;;  %975 = vmatprep.mubr.msk.bf16.mxu0 %vm1215_vm1, %v1214_v0 }
 0x742   :  { %971 = vmatprep.subr.bf16.mxu0 %v1214_v0 }
 0x745   :  { %972 = vmatpush3.bf16.msra.mxu0 %v1330_v3 }
 0x746   :  { %973 = vmatprep.subr.bf16.mxu0 %v1214_v0 }
 0x749   :  { %974 = vmatpush3.bf16.msra.mxu0 %v1337_v5 }
 0x74a   :  { %989 = vmatprep.subr.bf16.mxu0 %v1214_v0 }
 0x813   :  { %v347_v7 = vpop.f32.mrb[4].mxu0 }
 0x814   :  { %v348_v8 = vadd.f32 %v1361_v12, %v347_v7  ;;  %v957_v9 = vpop.f32.mrb[5].mxu0 }
 0x815   :  { %v350_v10 = vpop.f32.mrb[6].mxu0 }
 0x816   :  { %1042 = vtanh.f32 %v348_v8  ;;  %v958_v11 = vpop.f32.mrb[7].mxu0  ;;  %v886_v14 = vmul.f32 -1.442695, %v348_v8 }
 0x818   :  { %1044 = vpow2.f32 %v886_v14 }
 0x820   :  { %v1043_v13 = vpop.eup %1042 }
 0x821   :  { %366 = vrot.lane.b32.xlu1 %v1043_v13, %s1210_s1 }
 0x822   :  { %v1045_v15 = vpop.eup %1044 }
 0x823   :  { %v356_v16 = vadd.f32 1.0, %v1045_v15 }
 0x825   :  { %1046 = vrcp.f32 %v356_v16 }
 0x82f   :  { %v1047_v17 = vpop.eup %1046 }
 0x830   :  { %v364_v21 = vmul.f32 %v1047_v17, %v362_v20 }
 0x893   :  { %v367_v18 = vpop.permute.xlu1 %366 }
 0x894   :  { %v369_v19 = vmul.f32 %v1047_v17, %v367_v18 }
 0x896   :  { %371 = vrot.lane.b32.xlu1 %v369_v19, %s1217_s15 }
 0x908   :  { %v372_v22 = vpop.permute.xlu1 %371 }
 0x909   :  { %v374_v23 = vadd.f32 %v372_v22, %v364_v21 }
 0x90b   :  { %1048 = vtanh.f32 %v374_v23 }
 0x915   :  { %v1049_v24 = vpop.eup %1048 }
 0x916   :  { %377 = vrot.lane.b32.xlu0 %v1049_v24, %s1210_s1 }
 0x988   :  { %v378_v25 = vpop.permute.xlu0 %377 }
 0x989   :  { %v380_v26 = vmul.f32 %v1047_v17, %v378_v25 }
 0x98b   :  { %387 = vrot.lane.b32.xlu1 %v380_v26, %s1217_s15 }
 0x98f   :  { %382 = vrot.lane.b32.xlu1 %v374_v23, %s1218_s4 }
 0x9fd   :  { %v388_v27 = vpop.permute.xlu1 %387 }
 0x9fe   :  { %390 = vst.msk [vmem:[#allocation2] sm:$0xff] %vm78_vm0, %v388_v27  ;;  %392 = vst.msk [vmem:[#allocation12 + $0x10] sm:$0xff] %vm78_vm0, %v388_v27  ;;  %v580_v27 = vld [vmem:[#allocation4 + $0x14] sm:$0xf] }
 0xa01   :  { %v383_v28 = vpop.permute.xlu1 %382 }
 0xa02   :  { %385 = vst.msk [vmem:[#allocation3] sm:$0xff] %vm78_vm0, %v383_v28 }
 0xa05   :  { %v395_v29 = vld [vmem:[#allocation2] sm:$0xff] }
 0xa06   :  { %v397_v30 = vpack.c.bf16 %v395_v29, %v395_v29 }
 0xa08   :  { %399 = vrot.lane.b32.xlu0 %v397_v30, %s1216_s3 }
 0xa09   :  { %v396_v31 = vld [vmem:[#allocation3] sm:$0xff] }
 0xa0a   :  { %454 = vrot.lane.b32.xlu1 %v396_v31, %s1217_s15 }
 0xa7a   :  { %v400_v33 = vpop.permute.xlu0 %399 }
 0xa7b   :  { %v403_v34 = vsel %vm102_vm2, %v394_v32, %v400_v33 }
 0xa7c   :  { %966 = vmatmul.mubr.msk.bf16.vlgmr.msra.gmra.mrb[4].mxu1 %vm124_vm3, %v403_v34  ;;  %v455_v47 = vpop.permute.xlu1 %454 }
 0xa7d   :  { %980 = vmatpush3.bf16.msra.mxu1 %v1327_v2  ;;  %985 = vmatprep.mubr.msk.bf16.mxu1 %vm1215_vm1, %v1214_v0 }
 0xa7e   :  { %981 = vmatprep.subr.bf16.mxu1 %v1214_v0 }
 0xa81   :  { %982 = vmatpush3.bf16.msra.mxu1 %v1330_v3 }
 0xa82   :  { %983 = vmatprep.subr.bf16.mxu1 %v1214_v0 }
 0xa85   :  { %984 = vmatpush3.bf16.msra.mxu1 %v1337_v5 }
 0xa86   :  { %999 = vmatprep.subr.bf16.mxu1 %v1214_v0 }
 0xb4f   :  { %v440_v35 = vpop.f32.mrb[4].mxu1 }
 0xb50   :  { %v441_v36 = vadd.f32 %v1361_v12, %v440_v35  ;;  %v967_v37 = vpop.f32.mrb[5].mxu1 }
 0xb51   :  { %v443_v38 = vpop.f32.mrb[6].mxu1 }
 0xb52   :  { %1050 = vtanh.f32 %v441_v36  ;;  %v968_v39 = vpop.f32.mrb[7].mxu1  ;;  %v888_v41 = vmul.f32 -1.442695, %v441_v36 }
 0xb54   :  { %1052 = vpow2.f32 %v888_v41 }
 0xb5c   :  { %v1051_v40 = vpop.eup %1050 }
 0xb5d   :  { %459 = vrot.lane.b32.xlu0 %v1051_v40, %s1210_s1 }
 0xb5e   :  { %v1053_v42 = vpop.eup %1052 }
 0xb5f   :  { %v449_v43 = vadd.f32 1.0, %v1053_v42 }
 0xb61   :  { %1054 = vrcp.f32 %v449_v43 }
 0xb6b   :  { %v1055_v44 = vpop.eup %1054 }
 0xb6c   :  { %v457_v48 = vmul.f32 %v1055_v44, %v455_v47 }
 0xbcf   :  { %v460_v45 = vpop.permute.xlu0 %459 }
 0xbd0   :  { %v462_v46 = vmul.f32 %v1055_v44, %v460_v45 }
 0xbd2   :  { %464 = vrot.lane.b32.xlu0 %v462_v46, %s1217_s15 }
 0xc44   :  { %v465_v49 = vpop.permute.xlu0 %464 }
 0xc45   :  { %v467_v50 = vadd.f32 %v465_v49, %v457_v48 }
 0xc47   :  { %1056 = vtanh.f32 %v467_v50 }
 0xc51   :  { %v1057_v51 = vpop.eup %1056 }
 0xc52   :  { %470 = vrot.lane.b32.xlu1 %v1057_v51, %s1210_s1 }
 0xcc4   :  { %v471_v52 = vpop.permute.xlu1 %470 }
 0xcc5   :  { %v473_v53 = vmul.f32 %v1055_v44, %v471_v52 }
 0xcc7   :  { %480 = vrot.lane.b32.xlu0 %v473_v53, %s1217_s15 }
 0xccb   :  { %475 = vrot.lane.b32.xlu0 %v467_v50, %s1218_s4  ;;  %v673_v50 = vld [vmem:[#allocation4 + $0x18] sm:$0xf] }
 0xd39   :  { %v481_v54 = vpop.permute.xlu0 %480 }
 0xd3a   :  { %483 = vst.msk [vmem:[#allocation2] sm:$0xff] %vm78_vm0, %v481_v54  ;;  %485 = vst.msk [vmem:[#allocation12 + $0x18] sm:$0xff] %vm78_vm0, %v481_v54 }
 0xd3d   :  { %v476_v55 = vpop.permute.xlu0 %475 }
 0xd3e   :  { %478 = vst.msk [vmem:[#allocation3] sm:$0xff] %vm78_vm0, %v476_v55 }
 0xd41   :  { %v488_v56 = vld [vmem:[#allocation2] sm:$0xff] }
 0xd42   :  { %v490_v57 = vpack.c.bf16 %v488_v56, %v488_v56 }
 0xd44   :  { %492 = vrot.lane.b32.xlu1 %v490_v57, %s1216_s3 }
 0xd45   :  { %v489_v58 = vld [vmem:[#allocation3] sm:$0xff] }
 0xd46   :  { %547 = vrot.lane.b32.xlu0 %v489_v58, %s1217_s15 }
 0xdb6   :  { %v493_v60 = vpop.permute.xlu1 %492 }
 0xdb7   :  { %v496_v61 = vsel %vm102_vm2, %v487_v59, %v493_v60 }
 0xdb8   :  { %976 = vmatmul.mubr.msk.bf16.vlgmr.msra.gmra.mrb[8].mxu0 %vm124_vm3, %v496_v61  ;;  %v548_v15 = vpop.permute.xlu0 %547 }
 0xdb9   :  { %990 = vmatpush3.bf16.msra.mxu0 %v1327_v2  ;;  %995 = vmatprep.mubr.msk.bf16.mxu0 %vm1215_vm1, %v1214_v0 }
 0xdba   :  { %991 = vmatprep.subr.bf16.mxu0 %v1214_v0 }
 0xdbd   :  { %992 = vmatpush3.bf16.msra.mxu0 %v1330_v3 }
 0xdbe   :  { %993 = vmatprep.subr.bf16.mxu0 %v1214_v0 }
 0xdc1   :  { %994 = vmatpush3.bf16.msra.mxu0 %v1337_v5 }
 0xe8b   :  { %v533_v62 = vpop.f32.mrb[8].mxu0 }
 0xe8c   :  { %v534_v63 = vadd.f32 %v1361_v12, %v533_v62  ;;  %v977_v1 = vpop.f32.mrb[9].mxu0 }
 0xe8d   :  { %v536_v4 = vpop.f32.mrb[10].mxu0 }
 0xe8e   :  { %1058 = vtanh.f32 %v534_v63  ;;  %v978_v6 = vpop.f32.mrb[11].mxu0  ;;  %v890_v8 = vmul.f32 -1.442695, %v534_v63 }
 0xe90   :  { %1060 = vpow2.f32 %v890_v8 }
 0xe98   :  { %v1059_v7 = vpop.eup %1058 }
 0xe99   :  { %552 = vrot.lane.b32.xlu1 %v1059_v7, %s1210_s1 }
 0xe9a   :  { %v1061_v9 = vpop.eup %1060 }
 0xe9b   :  { %v542_v10 = vadd.f32 1.0, %v1061_v9 }
 0xe9d   :  { %1062 = vrcp.f32 %v542_v10 }
 0xea7   :  { %v1063_v11 = vpop.eup %1062 }
 0xea8   :  { %v550_v16 = vmul.f32 %v1063_v11, %v548_v15 }
 0xf0b   :  { %v553_v13 = vpop.permute.xlu1 %552 }
 0xf0c   :  { %v555_v14 = vmul.f32 %v1063_v11, %v553_v13 }
 0xf0e   :  { %557 = vrot.lane.b32.xlu1 %v555_v14, %s1217_s15 }
 0xf80   :  { %v558_v17 = vpop.permute.xlu1 %557 }
 0xf81   :  { %v560_v18 = vadd.f32 %v558_v17, %v550_v16 }
 0xf83   :  { %1064 = vtanh.f32 %v560_v18 }
 0xf8d   :  { %v1065_v19 = vpop.eup %1064 }
 0xf8e   :  { %563 = vrot.lane.b32.xlu0 %v1065_v19, %s1210_s1 }
0x1000   :  { %v564_v20 = vpop.permute.xlu0 %563 }
0x1001   :  { %v566_v21 = vmul.f32 %v1063_v11, %v564_v20 }
0x1003   :  { %573 = vrot.lane.b32.xlu1 %v566_v21, %s1217_s15 }
0x1007   :  { %568 = vrot.lane.b32.xlu1 %v560_v18, %s1218_s4  ;;  %v766_v18 = vld [vmem:[#allocation4 + $0x1c] sm:$0xf] }
0x1075   :  { %v574_v22 = vpop.permute.xlu1 %573 }
0x1076   :  { %576 = vst.msk [vmem:[#allocation2] sm:$0xff] %vm78_vm0, %v574_v22  ;;  %578 = vst.msk [vmem:[#allocation12 + $0x20] sm:$0xff] %vm78_vm0, %v574_v22 }
0x1079   :  { %v569_v23 = vpop.permute.xlu1 %568 }
0x107a   :  { %571 = vst.msk [vmem:[#allocation3] sm:$0xff] %vm78_vm0, %v569_v23 }
0x107d   :  { %v581_v24 = vld [vmem:[#allocation2] sm:$0xff] }
0x107e   :  { %v583_v25 = vpack.c.bf16 %v581_v24, %v581_v24 }
0x1080   :  { %585 = vrot.lane.b32.xlu0 %v583_v25, %s1216_s3 }
0x1081   :  { %v582_v26 = vld [vmem:[#allocation3] sm:$0xff] }
0x1082   :  { %640 = vrot.lane.b32.xlu1 %v582_v26, %s1217_s15 }
0x10f2   :  { %v586_v28 = vpop.permute.xlu0 %585 }
0x10f3   :  { %v589_v29 = vsel %vm102_vm2, %v580_v27, %v586_v28 }
0x10f4   :  { %986 = vmatmul.mubr.msk.bf16.vlgmr.msra.gmra.mrb[8].mxu1 %vm124_vm3, %v589_v29 }
0x10f5   :  { %1000 = vmatpush3.bf16.msra.mxu1 %v1327_v2  ;;  %1005 = vmatprep.mubr.msk.bf16.mxu1 %vm1215_vm1, %v1214_v0 }
0x10f6   :  { %1001 = vmatprep.subr.bf16.mxu1 %v1214_v0 }
0x10f9   :  { %1002 = vmatpush3.bf16.msra.mxu1 %v1330_v3 }
0x10fa   :  { %1003 = vmatprep.subr.bf16.mxu1 %v1214_v0 }
0x10fd   :  { %1004 = vmatpush3.bf16.msra.mxu1 %v1337_v5  ;;  %v641_v5 = vpop.permute.xlu1 %640 }
0x11c7   :  { %v626_v30 = vpop.f32.mrb[8].mxu1 }
0x11c8   :  { %v627_v31 = vadd.f32 %v1361_v12, %v626_v30  ;;  %v987_v32 = vpop.f32.mrb[9].mxu1 }
0x11c9   :  { %v629_v33 = vpop.f32.mrb[10].mxu1 }
0x11ca   :  { %1066 = vtanh.f32 %v627_v31  ;;  %v988_v34 = vpop.f32.mrb[11].mxu1  ;;  %v892_v2 = vmul.f32 -1.442695, %v627_v31 }
0x11cc   :  { %1068 = vpow2.f32 %v892_v2 }
0x11d4   :  { %v1067_v35 = vpop.eup %1066 }
0x11d5   :  { %645 = vrot.lane.b32.xlu0 %v1067_v35, %s1210_s1 }
0x11d6   :  { %v1069_v36 = vpop.eup %1068 }
0x11d7   :  { %v635_v37 = vadd.f32 1.0, %v1069_v36 }
0x11d9   :  { %1070 = vrcp.f32 %v635_v37 }
0x11e3   :  { %v1071_v3 = vpop.eup %1070 }
0x11e4   :  { %v643_v39 = vmul.f32 %v1071_v3, %v641_v5 }
0x1247   :  { %v646_v38 = vpop.permute.xlu0 %645 }
0x1248   :  { %v648_v0 = vmul.f32 %v1071_v3, %v646_v38 }
0x124a   :  { %650 = vrot.lane.b32.xlu0 %v648_v0, %s1217_s15 }
0x12bc   :  { %v651_v40 = vpop.permute.xlu0 %650 }
0x12bd   :  { %v653_v41 = vadd.f32 %v651_v40, %v643_v39 }
0x12bf   :  { %1072 = vtanh.f32 %v653_v41 }
0x12c9   :  { %v1073_v42 = vpop.eup %1072 }
0x12ca   :  { %656 = vrot.lane.b32.xlu1 %v1073_v42, %s1210_s1 }
0x133c   :  { %v657_v43 = vpop.permute.xlu1 %656 }
0x133d   :  { %v659_v44 = vmul.f32 %v1071_v3, %v657_v43 }
0x133f   :  { %666 = vrot.lane.b32.xlu0 %v659_v44, %s1217_s15 }
0x1343   :  { %661 = vrot.lane.b32.xlu0 %v653_v41, %s1218_s4 }
0x13b1   :  { %v667_v45 = vpop.permute.xlu0 %666 }
0x13b2   :  { %669 = vst.msk [vmem:[#allocation2] sm:$0xff] %vm78_vm0, %v667_v45  ;;  %671 = vst.msk [vmem:[#allocation12 + $0x28] sm:$0xff] %vm78_vm0, %v667_v45 }
0x13b5   :  { %v662_v46 = vpop.permute.xlu0 %661 }
0x13b6   :  { %664 = vst.msk [vmem:[#allocation3] sm:$0xff] %vm78_vm0, %v662_v46 }
0x13b9   :  { %v674_v47 = vld [vmem:[#allocation2] sm:$0xff] }
0x13ba   :  { %v676_v48 = vpack.c.bf16 %v674_v47, %v674_v47 }
0x13bc   :  { %678 = vrot.lane.b32.xlu1 %v676_v48, %s1216_s3 }
0x13bd   :  { %v675_v49 = vld [vmem:[#allocation3] sm:$0xff] }
0x13be   :  { %733 = vrot.lane.b32.xlu0 %v675_v49, %s1217_s15 }
0x142e   :  { %v679_v51 = vpop.permute.xlu1 %678 }
0x142f   :  { %v682_v52 = vsel %vm102_vm2, %v673_v50, %v679_v51 }
0x1430   :  { %996 = vmatmul.mubr.msk.bf16.vlgmr.msra.gmra.mrb[12].mxu0 %vm124_vm3, %v682_v52  ;;  %v734_v4 = vpop.permute.xlu0 %733 }
0x1503   :  { %v719_v53 = vpop.f32.mrb[12].mxu0 }
0x1504   :  { %v720_v54 = vadd.f32 %v1361_v12, %v719_v53  ;;  %v997_v55 = vpop.f32.mrb[13].mxu0 }
0x1505   :  { %v722_v56 = vpop.f32.mrb[14].mxu0 }
0x1506   :  { %1074 = vtanh.f32 %v720_v54  ;;  %v998_v57 = vpop.f32.mrb[15].mxu0  ;;  %v894_v59 = vmul.f32 -1.442695, %v720_v54 }
0x1508   :  { %1076 = vpow2.f32 %v894_v59 }
0x1510   :  { %v1075_v58 = vpop.eup %1074 }
0x1511   :  { %738 = vrot.lane.b32.xlu1 %v1075_v58, %s1210_s1 }
0x1512   :  { %v1077_v60 = vpop.eup %1076 }
0x1513   :  { %v728_v61 = vadd.f32 1.0, %v1077_v60 }
0x1515   :  { %1078 = vrcp.f32 %v728_v61 }
0x151f   :  { %v1079_v62 = vpop.eup %1078 }
0x1520   :  { %v736_v6 = vmul.f32 %v1079_v62, %v734_v4 }
0x1583   :  { %v739_v63 = vpop.permute.xlu1 %738 }
0x1584   :  { %v741_v1 = vmul.f32 %v1079_v62, %v739_v63 }
0x1586   :  { %743 = vrot.lane.b32.xlu1 %v741_v1, %s1217_s15 }
0x15f8   :  { %v744_v7 = vpop.permute.xlu1 %743 }
0x15f9   :  { %v746_v8 = vadd.f32 %v744_v7, %v736_v6 }
0x15fb   :  { %1080 = vtanh.f32 %v746_v8 }
0x1605   :  { %v1081_v9 = vpop.eup %1080 }
0x1606   :  { %749 = vrot.lane.b32.xlu0 %v1081_v9, %s1210_s1 }
0x1678   :  { %v750_v10 = vpop.permute.xlu0 %749 }
0x1679   :  { %v752_v11 = vmul.f32 %v1079_v62, %v750_v10 }
0x167b   :  { %759 = vrot.lane.b32.xlu1 %v752_v11, %s1217_s15 }
0x167f   :  { %754 = vrot.lane.b32.xlu1 %v746_v8, %s1218_s4 }
0x16ed   :  { %v760_v13 = vpop.permute.xlu1 %759 }
0x16ee   :  { %762 = vst.msk [vmem:[#allocation2] sm:$0xff] %vm78_vm0, %v760_v13  ;;  %764 = vst.msk [vmem:[#allocation12 + $0x30] sm:$0xff] %vm78_vm0, %v760_v13 }
0x16f1   :  { %v755_v14 = vpop.permute.xlu1 %754 }
0x16f2   :  { %757 = vst.msk [vmem:[#allocation3] sm:$0xff] %vm78_vm0, %v755_v14 }
0x16f5   :  { %v767_v15 = vld [vmem:[#allocation2] sm:$0xff] }
0x16f6   :  { %v769_v16 = vpack.c.bf16 %v767_v15, %v767_v15 }
0x16f8   :  { %771 = vrot.lane.b32.xlu0 %v769_v16, %s1216_s3 }
0x16f9   :  { %v768_v17 = vld [vmem:[#allocation3] sm:$0xff] }
0x16fa   :  { %826 = vrot.lane.b32.xlu1 %v768_v17, %s1217_s15 }
0x176a   :  { %v772_v19 = vpop.permute.xlu0 %771 }
0x176b   :  { %v775_v20 = vsel %vm102_vm2, %v766_v18, %v772_v19 }
0x176c   :  { %1006 = vmatmul.mubr.msk.bf16.vlgmr.msra.gmra.mrb[12].mxu1 %vm124_vm3, %v775_v20  ;;  %v827_v33 = vpop.permute.xlu1 %826 }
0x183f   :  { %v812_v21 = vpop.f32.mrb[12].mxu1 }
0x1840   :  { %v813_v22 = vadd.f32 %v1361_v12, %v812_v21  ;;  %v1007_v23 = vpop.f32.mrb[13].mxu1 }
0x1841   :  { %v815_v24 = vpop.f32.mrb[14].mxu1 }
0x1842   :  { %1082 = vtanh.f32 %v813_v22  ;;  %v1008_v25 = vpop.f32.mrb[15].mxu1  ;;  %v896_v27 = vmul.f32 -1.442695, %v813_v22 }
0x1844   :  { %1084 = vpow2.f32 %v896_v27 }
0x184c   :  { %v1083_v26 = vpop.eup %1082 }
0x184d   :  { %831 = vrot.lane.b32.xlu0 %v1083_v26, %s1210_s1 }
0x184e   :  { %v1085_v28 = vpop.eup %1084 }
0x184f   :  { %v821_v29 = vadd.f32 1.0, %v1085_v28 }
0x1851   :  { %1086 = vrcp.f32 %v821_v29 }
0x185b   :  { %v1087_v30 = vpop.eup %1086 }
0x185c   :  { %v829_v34 = vmul.f32 %v1087_v30, %v827_v33 }
0x18bf   :  { %v832_v31 = vpop.permute.xlu0 %831 }
0x18c0   :  { %v834_v32 = vmul.f32 %v1087_v30, %v832_v31 }
0x18c2   :  { %836 = vrot.lane.b32.xlu0 %v834_v32, %s1217_s15 }
0x1934   :  { %v837_v12 = vpop.permute.xlu0 %836 }
0x1935   :  { %v839_v35 = vadd.f32 %v837_v12, %v829_v34 }
0x1937   :  { %1088 = vtanh.f32 %v839_v35 }
0x1941   :  { %v1089_v2 = vpop.eup %1088 }
0x1942   :  { %842 = vrot.lane.b32.xlu1 %v1089_v2, %s1210_s1 }
0x1946   :  { %847 = vrot.lane.b32.xlu1 %v839_v35, %s1218_s4 }
0x19b4   :  { %v843_v36 = vpop.permute.xlu1 %842 }
0x19b5   :  { %v845_v37 = vmul.f32 %v1087_v30, %v843_v36 }
0x19b7   :  { %852 = vrot.lane.b32.xlu0 %v845_v37, %s1217_s15 }
0x19b8   :  { %v848_v3 = vpop.permute.xlu1 %847 }
0x19b9   :  { %850 = vst.msk [vmem:[#allocation3] sm:$0xff] %vm78_vm0, %v848_v3 }
0x1a29   :  { %v853_v38 = vpop.permute.xlu0 %852 }
0x1a2a   :  { %855 = vst.msk [vmem:[#allocation2] sm:$0xff] %vm78_vm0, %v853_v38  ;;  %857 = vst.msk [vmem:[#allocation12 + $0x38] sm:$0xff] %vm78_vm0, %v853_v38 }
0x1a2b   :  { %1189 = shalt.err (!%p1186_p8)
}
0x1a2c   :  { %s1190_s23 = scalar_lea.hbm %s1518_s5, 1024 }
0x1a2d   :  { %p1191_p9 = scmp.ne.s32.totalorder %s1518_s5, %s1190_s23  ;;  %p1194_p10 = scmp.lt.u32.totalorder %s1190_s23, %s1518_s5 }
0x1a2f   :  { %p1196_p11 = pnand %p1194_p10, %p1191_p9 }
0x1a31   :  { %1199 = shalt.err (!%p1196_p11)
}
0x1a32   :  { %s1220_s28 = smov 128   ;;  %s1221_s29 = smov 8  }
0x1a33   :  { %869 = dma.vmem_to_hbm [thread:$0]  %s864_s19, 1024, %s1518_s5, [#allocation6], %s1220_s28, %s1220_s28, %s1221_s29  }
0x1a34   :  { %1206 = dma.done.wait [#allocation6], 1024  }
0x1a35   :  { %1207 = vsyncadd [#allocation6], 4294966272 }
0x1a36   :  { %873 = vsyncpa [#allocation5], 1 }
0x1a37   :  { %874 = vsyncpa [#allocation8], 1 }
0x1a38   :  { %875 = vsyncpa [#allocation11], 1 }
0x1a39   :  { %876 = vsyncpa [#allocation6], 1 }

</bundles_post_ra>
